<compile_context>
chip_gen: v7x
topology: tpu7x:2x2x1
jax: 0.10.0
libtpu: 0.0.40
codegen_flags: <defaults>
</compile_context>

<pallas_src>
import math

import jax
import jax.numpy as jnp
from jax import lax
from jax.experimental import pallas as pl
from jax.experimental.pallas import tpu as pltpu


# ----------------------------- Pallas kernel --------------------------------
def _make_attn_kernel(n_heads, d_kv, num_buckets, q_tile):
    inner = n_heads * d_kv

    def kernel(table_ref, x_ref, wqkv_ref, wo_ref, bucket_ref, o_ref,
               qkv_sc, ctx_sc):
        qt = pl.program_id(1)

        # --- once per batch item (first q-tile): fused QKV projection -------
        # x(klen, d_model) @ Wqkv(d_model, 3*inner): one wide, lane-dense MXU
        # matmul (bf16 in, f32 acc), cached as bf16 in persistent VMEM scratch.
        @pl.when(qt == 0)
        def _():
            x = x_ref[0]                                     # (klen, d_model) bf16
            qkv = jnp.dot(x, wqkv_ref[...],
                          preferred_element_type=jnp.float32)
            qkv_sc[...] = qkv.astype(jnp.bfloat16)

        q_start = pl.multiple_of(qt * q_tile, q_tile)
        bucket = bucket_ref[...]                             # (TQ, klen) int32

        # Per-head attention: n_heads is a small static constant, so a static
        # Python loop over 2-D tiles keeps everything plain MXU/VPU ops.
        for h in range(n_heads):
            lo = h * d_kv
            qh = qkv_sc[pl.ds(q_start, q_tile), lo:lo + d_kv]           # (TQ, d_kv)
            kh = qkv_sc[:, inner + lo:inner + lo + d_kv]                # (klen, d_kv)
            vh = qkv_sc[:, 2 * inner + lo:2 * inner + lo + d_kv]        # (klen, d_kv)

            # scores = q @ k^T  (contract the shared last dim directly; no
            # transpose of k).  No 1/sqrt(d_kv) scaling in T5.
            s = lax.dot_general(qh, kh, (((1,), (1,)), ((), ())),
                                preferred_element_type=jnp.float32)     # (TQ, klen)

            # Relative-position bias, gathered in-kernel from the SMEM table
            # (scalar reads) via the int32 bucket map — replaces shipping the
            # materialized (H, qlen, klen) bias tensor through HBM.
            bias = jnp.zeros_like(s)
            for b in range(num_buckets):
                bias = jnp.where(bucket == b, table_ref[b * n_heads + h], bias)
            s = s + bias
            # TODO(synk): a batch-dependent mask / graph_bias would need an
            # extra per-batch input added to `s` here.

            # softmax over the key axis, strictly in float32 (as in the module)
            m = jnp.max(s, axis=-1, keepdims=True)
            p = jnp.exp(s - m)
            w = p / jnp.sum(p, axis=-1, keepdims=True)

            # per-head context -> lane slice of the ctx slab (f32 accumulator)
            ctx_sc[:, lo:lo + d_kv] = jnp.dot(
                w.astype(jnp.bfloat16), vh, preferred_element_type=jnp.float32)

        # Single wide output projection from the ctx slab; one store per step.
        o_ref[0] = jnp.dot(ctx_sc[...].astype(jnp.bfloat16), wo_ref[...],
                           preferred_element_type=jnp.float32).astype(o_ref.dtype)

    return kernel


def amr_t5_attention_pallas(x, wq, wk, wv, wo, rel_bias_table, *,
                            n_heads, d_kv, num_buckets, is_decoder=False,
                            q_tile=None):
    """x: (bs, qlen, d_model); w{q,k,v}: (d_model, n_heads*d_kv);
    wo: (n_heads*d_kv, d_model); rel_bias_table: (num_buckets, n_heads)."""
    bs, qlen, d_model = x.shape
    klen = qlen                              # self-attention, no cache
    inner = n_heads * d_kv
    if q_tile is None:
        q_tile = qlen if qlen <= 256 else 256
    assert qlen % q_tile == 0, "qlen must be a multiple of the q tile"

    # bf16 MXU operands (f32 accumulation inside the kernel).
    x_bf = x.astype(jnp.bfloat16)
    wqkv = jnp.concatenate([wq, wk, wv], axis=1).astype(jnp.bfloat16)
    wo_bf = wo.astype(jnp.bfloat16)

    # Tiny, position-only inputs for the in-kernel bias gather.
    table_flat = rel_bias_table.astype(jnp.float32).reshape(-1)   # (B*H,) -> SMEM
    bucket_map = make_relative_bucket_map(qlen, klen, num_buckets, is_decoder)

    kernel = _make_attn_kernel(n_heads, d_kv, num_buckets, q_tile)

    out = pl.pallas_call(
        kernel,
        out_shape=jax.ShapeDtypeStruct((bs, qlen, d_model), jnp.float32),
        grid_spec=pltpu.PrefetchScalarGridSpec(
            num_scalar_prefetch=0,
            grid=(bs, qlen // q_tile),
            in_specs=[
                # relative-attention bias table -> SMEM (scalar reads in-kernel)
                pl.BlockSpec(memory_space=pltpu.MemorySpace.SMEM),
                # activations: full sequence per batch item (needed for K/V)
                pl.BlockSpec((1, qlen, d_model), lambda b, qt: (b, 0, 0)),
                # grid-invariant weights: single-buffered (no 2x VMEM waste)
                pl.BlockSpec((d_model, 3 * inner), lambda b, qt: (0, 0),
                             pipeline_mode=pl.Buffered(buffer_count=1)),
                pl.BlockSpec((inner, d_model), lambda b, qt: (0, 0),
                             pipeline_mode=pl.Buffered(buffer_count=1)),
                # int32 relative-position bucket map, tiled along the q axis
                pl.BlockSpec((q_tile, klen), lambda b, qt: (qt, 0)),
            ],
            out_specs=pl.BlockSpec((1, q_tile, d_model),
                                   lambda b, qt: (b, qt, 0)),
            scratch_shapes=[
                pltpu.VMEM((klen, 3 * inner), jnp.bfloat16),   # fused Q|K|V cache
                pltpu.VMEM((q_tile, inner), jnp.float32),      # per-tile ctx slab
            ],
        ),
        compiler_params=pltpu.CompilerParams(
            # batch is parallel (feeds both v7x TCs); the q-tile axis carries
            # the QKV scratch, so it must stay "arbitrary".
            dimension_semantics=("parallel", "arbitrary"),
            # Headroom over the default scoped limit for larger q/k tiles.
            vmem_limit_bytes=64 * 1024 * 1024,
        ),
    )(table_flat, x_bf, wqkv, wo_bf, bucket_map)
    return out


# --------------------- relative position bias (JAX glue) --------------------
def _relative_position_bucket(relative_position, bidirectional=True,
                              num_buckets=32, max_distance=128):
    ret = jnp.zeros_like(relative_position)
    n = -relative_position
    if bidirectional:
        num_buckets //= 2
        ret = ret + (n < 0).astype(jnp.int32) * num_buckets
        n = jnp.abs(n)
    else:
        n = jnp.maximum(n, 0)
    max_exact = num_buckets // 2
    is_small = n < max_exact
    safe_n = jnp.maximum(n, 1).astype(jnp.float32)   # avoid log(0); masked below
    val_if_large = max_exact + (
        jnp.log(safe_n / max_exact) / math.log(max_distance / max_exact)
        * (num_buckets - max_exact)
    ).astype(jnp.int32)
    val_if_large = jnp.minimum(val_if_large, num_buckets - 1)
    ret = ret + jnp.where(is_small, n, val_if_large)
    return ret


def make_relative_bucket_map(qlen, klen, num_buckets, is_decoder):
    context_position = jnp.arange(qlen, dtype=jnp.int32)[:, None]
    memory_position = jnp.arange(klen, dtype=jnp.int32)[None, :]
    relative_position = memory_position - context_position
    return _relative_position_bucket(
        relative_position, bidirectional=not is_decoder,
        num_buckets=num_buckets).astype(jnp.int32)          # (qlen, klen)


def compute_bias(qlen, klen, rel_attn_bias_weight, num_buckets, is_decoder):
    rp_bucket = make_relative_bucket_map(qlen, klen, num_buckets, is_decoder)
    values = rel_attn_bias_weight[rp_bucket]                # (qlen, klen, n_heads)
    values = jnp.transpose(values, (2, 0, 1))[None]         # (1, n_heads, qlen, klen)
    return values


# ------------------------------- reference ----------------------------------
def reference_forward(x, wq, wk, wv, wo, position_bias, n_heads, d_kv):
    bs, qlen, d_model = x.shape
    def shape_(t):
        return t.reshape(bs, qlen, n_heads, d_kv).transpose(0, 2, 1, 3)
    q = shape_(x @ wq)
    k = shape_(x @ wk)
    v = shape_(x @ wv)
    scores = jnp.einsum("bhqd,bhkd->bhqk", q, k) + position_bias
    weights = jax.nn.softmax(scores.astype(jnp.float32), axis=-1).astype(scores.dtype)
    ctx = jnp.einsum("bhqk,bhkd->bhqd", weights, v)
    ctx = ctx.transpose(0, 2, 1, 3).reshape(bs, qlen, n_heads * d_kv)
    return ctx @ wo


# --------------------------------- main --------------------------------------
if __name__ == "__main__":
    # Small T5-ish config
    bs, qlen = 2, 8
    d_model, n_heads, d_kv = 32, 4, 8
    inner_dim = n_heads * d_kv
    num_buckets = 32
    is_decoder = False

    key = jax.random.PRNGKey(0)
    k0, k1, k2, k3, k4, k5 = jax.random.split(key, 6)
    x = jax.random.normal(k0, (bs, qlen, d_model), dtype=jnp.float32)
    # nn.Linear(in, out, bias=False): y = x @ W.T with W:(out,in). We store the
    # transposed (in, out) matrix directly so the projection is x @ W.
    wq = jax.random.normal(k1, (d_model, inner_dim), dtype=jnp.float32) * 0.05
    wk = jax.random.normal(k2, (d_model, inner_dim), dtype=jnp.float32) * 0.05
    wv = jax.random.normal(k3, (d_model, inner_dim), dtype=jnp.float32) * 0.05
    wo = jax.random.normal(k4, (inner_dim, d_model), dtype=jnp.float32) * 0.05
    rel_bias_emb = jax.random.normal(k5, (num_buckets, n_heads), dtype=jnp.float32) * 0.1

    # TODO(synk): use_feature / cross-attention (kv) / past_key_value cache /
    # head_mask / graph_bias / dropout-in-training paths of the PyTorch module
    # are not exercised in this synthetic encoder self-attention config.
    out = amr_t5_attention_pallas(
        x, wq, wk, wv, wo, rel_bias_emb,
        n_heads=n_heads, d_kv=d_kv, num_buckets=num_buckets,
        is_decoder=is_decoder)
    out = jax.block_until_ready(out)

    # has_relative_attention_bias=True, position_bias=None -> module computes it;
    # reproduce it here (f32) for the reference and for the output tuple.
    position_bias = compute_bias(qlen, qlen, rel_bias_emb, num_buckets, is_decoder)
    ref = reference_forward(x, wq, wk, wv, wo, position_bias, n_heads, d_kv)

    assert out.shape == (bs, qlen, d_model)
    # Tolerance accounts for bf16 MXU operands (f32 accumulation, f32 softmax).
    max_err = float(jnp.max(jnp.abs(out - ref)))
    assert jnp.allclose(out, ref, atol=2e-2, rtol=2e-2), max_err

    # Module outputs tuple: (context, present_key_value_state=(None,), position_bias)
    outputs = (out, (None,), position_bias)
    del outputs

    print("KERNEL_OK")
</pallas_src>

<mosaic_0001>
module attributes {stable_mosaic.version = 11 : i64} {
  func.func @kernel(%arg0: i32, %arg1: i32, %arg2: memref<128xf32, #tpu.memory_space<smem>>, %arg3: memref<1x8x32xbf16, #tpu.memory_space<vmem>>, %arg4: memref<32x96xbf16, #tpu.memory_space<vmem>>, %arg5: memref<32x32xbf16, #tpu.memory_space<vmem>>, %arg6: memref<8x8xi32, #tpu.memory_space<vmem>>, %arg7: memref<1x8x32xf32, #tpu.memory_space<vmem>>, %arg8: memref<8x96xbf16, #tpu.memory_space<vmem>>, %arg9: memref<8x32xf32, #tpu.memory_space<vmem>>) attributes {dimension_semantics = [#tpu.dimension_semantics<parallel>, #tpu.dimension_semantics<arbitrary>], iteration_bounds = array<i64: 2, 1>, scalar_prefetch = 0 : i64, scratch_operands = 2 : i64, tpu.core_type = #tpu.core_type<tc>, window_params = [{transform_indices = @transform_0, window_bounds = array<i64: 128>}, {transform_indices = @transform_1, window_bounds = array<i64: 1, 8, 32>}, {pipeline_mode = #tpu.pipeline_mode<synchronous>, transform_indices = @transform_2, window_bounds = array<i64: 32, 96>}, {pipeline_mode = #tpu.pipeline_mode<synchronous>, transform_indices = @transform_3, window_bounds = array<i64: 32, 32>}, {transform_indices = @transform_4, window_bounds = array<i64: 8, 8>}, {transform_indices = @transform_5, window_bounds = array<i64: 1, 8, 32>}]} {
    %c0_i32 = arith.constant 0 : i32
    %0 = arith.cmpi eq, %arg1, %c0_i32 : i32
    %1 = arith.extui %0 : i1 to i32
    %c0_i32_0 = arith.constant 0 : i32
    %2 = arith.cmpi ne, %1, %c0_i32_0 : i32
    scf.if %2 {
      %c0_156 = arith.constant 0 : index
      %c0_157 = arith.constant 0 : index
      %c0_158 = arith.constant 0 : index
      %729 = vector.load %arg3[%c0_156, %c0_157, %c0_158] : memref<1x8x32xbf16, #tpu.memory_space<vmem>>, vector<1x8x32xbf16>
      %730 = vector.shape_cast %729 : vector<1x8x32xbf16> to vector<8x32xbf16>
      %c0_159 = arith.constant 0 : index
      %c0_160 = arith.constant 0 : index
      %731 = vector.load %arg4[%c0_159, %c0_160] : memref<32x96xbf16, #tpu.memory_space<vmem>>, vector<32x96xbf16>
      %cst_161 = arith.constant dense<0.000000e+00> : vector<8x96xf32>
      %732 = tpu.matmul %730, %731, %cst_161 {dimension_numbers = #tpu.dot_dimension_numbers<[1], [0], [0], [1], [0, 0, 1, 1], [], []>} : vector<8x32xbf16>, vector<32x96xbf16>, vector<8x96xf32> -> vector<8x96xf32>
      %733 = arith.truncf %732 : vector<8x96xf32> to vector<8x96xbf16>
      %c0_162 = arith.constant 0 : index
      %c0_163 = arith.constant 0 : index
      %734 = vector.load %arg8[%c0_162, %c0_163] : memref<8x96xbf16, #tpu.memory_space<vmem>>, vector<8x96xbf16>
      tpu.vector_store %arg8[%c0_162, %c0_163], %733 {strides = array<i32>} : memref<8x96xbf16, #tpu.memory_space<vmem>>, vector<8x96xbf16>,
    } else {
    }
    %c8_i32 = arith.constant 8 : i32
    %3 = arith.muli %arg1, %c8_i32 : i32
    %4 = tpu.assume_multiple %3, 8 : i32
    %c0 = arith.constant 0 : index
    %c0_1 = arith.constant 0 : index
    %5 = vector.load %arg6[%c0, %c0_1] : memref<8x8xi32, #tpu.memory_space<vmem>>, vector<8x8xi32>
    %6 = arith.index_cast %4 : i32 to index
    %c0_2 = arith.constant 0 : index
    %7 = vector.load %arg8[%6, %c0_2] : memref<8x96xbf16, #tpu.memory_space<vmem>>, vector<8x8xbf16>
    %c0_3 = arith.constant 0 : index
    %c32 = arith.constant 32 : index
    %8 = vector.load %arg8[%c0_3, %c32] : memref<8x96xbf16, #tpu.memory_space<vmem>>, vector<8x8xbf16>
    %c0_4 = arith.constant 0 : index
    %c64 = arith.constant 64 : index
    %9 = vector.load %arg8[%c0_4, %c64] : memref<8x96xbf16, #tpu.memory_space<vmem>>, vector<8x8xbf16>
    %cst = arith.constant dense<0.000000e+00> : vector<8x8xf32>
    %10 = tpu.matmul %7, %8, %cst {dimension_numbers = #tpu.dot_dimension_numbers<[1], [1], [0], [0], [0, 0, 1, 0], [], []>} : vector<8x8xbf16>, vector<8x8xbf16>, vector<8x8xf32> -> vector<8x8xf32>
    %cst_5 = arith.constant 0.000000e+00 : f32
    %11 = vector.broadcast %cst_5 : f32 to vector<8x8xf32>
    %c0_i32_6 = arith.constant 0 : i32
    %12 = vector.broadcast %c0_i32_6 : i32 to vector<8x8xi32>
    %13 = arith.cmpi eq, %5, %12 : vector<8x8xi32>
    %c0_7 = arith.constant 0 : index
    %14 = memref.load %arg2[%c0_7] : memref<128xf32, #tpu.memory_space<smem>>
    %15 = vector.broadcast %14 : f32 to vector<8x8xf32>
    %16 = arith.select %13, %15, %11 : vector<8x8xi1>, vector<8x8xf32>
    %c1_i32 = arith.constant 1 : i32
    %17 = vector.broadcast %c1_i32 : i32 to vector<8x8xi32>
    %18 = arith.cmpi eq, %5, %17 : vector<8x8xi32>
    %c4 = arith.constant 4 : index
    %19 = memref.load %arg2[%c4] : memref<128xf32, #tpu.memory_space<smem>>
    %20 = vector.broadcast %19 : f32 to vector<8x8xf32>
    %21 = arith.select %18, %20, %16 : vector<8x8xi1>, vector<8x8xf32>
    %c2_i32 = arith.constant 2 : i32
    %22 = vector.broadcast %c2_i32 : i32 to vector<8x8xi32>
    %23 = arith.cmpi eq, %5, %22 : vector<8x8xi32>
    %c8 = arith.constant 8 : index
    %24 = memref.load %arg2[%c8] : memref<128xf32, #tpu.memory_space<smem>>
    %25 = vector.broadcast %24 : f32 to vector<8x8xf32>
    %26 = arith.select %23, %25, %21 : vector<8x8xi1>, vector<8x8xf32>
    %c3_i32 = arith.constant 3 : i32
    %27 = vector.broadcast %c3_i32 : i32 to vector<8x8xi32>
    %28 = arith.cmpi eq, %5, %27 : vector<8x8xi32>
    %c12 = arith.constant 12 : index
    %29 = memref.load %arg2[%c12] : memref<128xf32, #tpu.memory_space<smem>>
    %30 = vector.broadcast %29 : f32 to vector<8x8xf32>
    %31 = arith.select %28, %30, %26 : vector<8x8xi1>, vector<8x8xf32>
    %c4_i32 = arith.constant 4 : i32
    %32 = vector.broadcast %c4_i32 : i32 to vector<8x8xi32>
    %33 = arith.cmpi eq, %5, %32 : vector<8x8xi32>
    %c16 = arith.constant 16 : index
    %34 = memref.load %arg2[%c16] : memref<128xf32, #tpu.memory_space<smem>>
    %35 = vector.broadcast %34 : f32 to vector<8x8xf32>
    %36 = arith.select %33, %35, %31 : vector<8x8xi1>, vector<8x8xf32>
    %c5_i32 = arith.constant 5 : i32
    %37 = vector.broadcast %c5_i32 : i32 to vector<8x8xi32>
    %38 = arith.cmpi eq, %5, %37 : vector<8x8xi32>
    %c20 = arith.constant 20 : index
    %39 = memref.load %arg2[%c20] : memref<128xf32, #tpu.memory_space<smem>>
    %40 = vector.broadcast %39 : f32 to vector<8x8xf32>
    %41 = arith.select %38, %40, %36 : vector<8x8xi1>, vector<8x8xf32>
    %c6_i32 = arith.constant 6 : i32
    %42 = vector.broadcast %c6_i32 : i32 to vector<8x8xi32>
    %43 = arith.cmpi eq, %5, %42 : vector<8x8xi32>
    %c24 = arith.constant 24 : index
    %44 = memref.load %arg2[%c24] : memref<128xf32, #tpu.memory_space<smem>>
    %45 = vector.broadcast %44 : f32 to vector<8x8xf32>
    %46 = arith.select %43, %45, %41 : vector<8x8xi1>, vector<8x8xf32>
    %c7_i32 = arith.constant 7 : i32
    %47 = vector.broadcast %c7_i32 : i32 to vector<8x8xi32>
    %48 = arith.cmpi eq, %5, %47 : vector<8x8xi32>
    %c28 = arith.constant 28 : index
    %49 = memref.load %arg2[%c28] : memref<128xf32, #tpu.memory_space<smem>>
    %50 = vector.broadcast %49 : f32 to vector<8x8xf32>
    %51 = arith.select %48, %50, %46 : vector<8x8xi1>, vector<8x8xf32>
    %c8_i32_8 = arith.constant 8 : i32
    %52 = vector.broadcast %c8_i32_8 : i32 to vector<8x8xi32>
    %53 = arith.cmpi eq, %5, %52 : vector<8x8xi32>
    %c32_9 = arith.constant 32 : index
    %54 = memref.load %arg2[%c32_9] : memref<128xf32, #tpu.memory_space<smem>>
    %55 = vector.broadcast %54 : f32 to vector<8x8xf32>
    %56 = arith.select %53, %55, %51 : vector<8x8xi1>, vector<8x8xf32>
    %c9_i32 = arith.constant 9 : i32
    %57 = vector.broadcast %c9_i32 : i32 to vector<8x8xi32>
    %58 = arith.cmpi eq, %5, %57 : vector<8x8xi32>
    %c36 = arith.constant 36 : index
    %59 = memref.load %arg2[%c36] : memref<128xf32, #tpu.memory_space<smem>>
    %60 = vector.broadcast %59 : f32 to vector<8x8xf32>
    %61 = arith.select %58, %60, %56 : vector<8x8xi1>, vector<8x8xf32>
    %c10_i32 = arith.constant 10 : i32
    %62 = vector.broadcast %c10_i32 : i32 to vector<8x8xi32>
    %63 = arith.cmpi eq, %5, %62 : vector<8x8xi32>
    %c40 = arith.constant 40 : index
    %64 = memref.load %arg2[%c40] : memref<128xf32, #tpu.memory_space<smem>>
    %65 = vector.broadcast %64 : f32 to vector<8x8xf32>
    %66 = arith.select %63, %65, %61 : vector<8x8xi1>, vector<8x8xf32>
    %c11_i32 = arith.constant 11 : i32
    %67 = vector.broadcast %c11_i32 : i32 to vector<8x8xi32>
    %68 = arith.cmpi eq, %5, %67 : vector<8x8xi32>
    %c44 = arith.constant 44 : index
    %69 = memref.load %arg2[%c44] : memref<128xf32, #tpu.memory_space<smem>>
    %70 = vector.broadcast %69 : f32 to vector<8x8xf32>
    %71 = arith.select %68, %70, %66 : vector<8x8xi1>, vector<8x8xf32>
    %c12_i32 = arith.constant 12 : i32
    %72 = vector.broadcast %c12_i32 : i32 to vector<8x8xi32>
    %73 = arith.cmpi eq, %5, %72 : vector<8x8xi32>
    %c48 = arith.constant 48 : index
    %74 = memref.load %arg2[%c48] : memref<128xf32, #tpu.memory_space<smem>>
    %75 = vector.broadcast %74 : f32 to vector<8x8xf32>
    %76 = arith.select %73, %75, %71 : vector<8x8xi1>, vector<8x8xf32>
    %c13_i32 = arith.constant 13 : i32
    %77 = vector.broadcast %c13_i32 : i32 to vector<8x8xi32>
    %78 = arith.cmpi eq, %5, %77 : vector<8x8xi32>
    %c52 = arith.constant 52 : index
    %79 = memref.load %arg2[%c52] : memref<128xf32, #tpu.memory_space<smem>>
    %80 = vector.broadcast %79 : f32 to vector<8x8xf32>
    %81 = arith.select %78, %80, %76 : vector<8x8xi1>, vector<8x8xf32>
    %c14_i32 = arith.constant 14 : i32
    %82 = vector.broadcast %c14_i32 : i32 to vector<8x8xi32>
    %83 = arith.cmpi eq, %5, %82 : vector<8x8xi32>
    %c56 = arith.constant 56 : index
    %84 = memref.load %arg2[%c56] : memref<128xf32, #tpu.memory_space<smem>>
    %85 = vector.broadcast %84 : f32 to vector<8x8xf32>
    %86 = arith.select %83, %85, %81 : vector<8x8xi1>, vector<8x8xf32>
    %c15_i32 = arith.constant 15 : i32
    %87 = vector.broadcast %c15_i32 : i32 to vector<8x8xi32>
    %88 = arith.cmpi eq, %5, %87 : vector<8x8xi32>
    %c60 = arith.constant 60 : index
    %89 = memref.load %arg2[%c60] : memref<128xf32, #tpu.memory_space<smem>>
    %90 = vector.broadcast %89 : f32 to vector<8x8xf32>
    %91 = arith.select %88, %90, %86 : vector<8x8xi1>, vector<8x8xf32>
    %c16_i32 = arith.constant 16 : i32
    %92 = vector.broadcast %c16_i32 : i32 to vector<8x8xi32>
    %93 = arith.cmpi eq, %5, %92 : vector<8x8xi32>
    %c64_10 = arith.constant 64 : index
    %94 = memref.load %arg2[%c64_10] : memref<128xf32, #tpu.memory_space<smem>>
    %95 = vector.broadcast %94 : f32 to vector<8x8xf32>
    %96 = arith.select %93, %95, %91 : vector<8x8xi1>, vector<8x8xf32>
    %c17_i32 = arith.constant 17 : i32
    %97 = vector.broadcast %c17_i32 : i32 to vector<8x8xi32>
    %98 = arith.cmpi eq, %5, %97 : vector<8x8xi32>
    %c68 = arith.constant 68 : index
    %99 = memref.load %arg2[%c68] : memref<128xf32, #tpu.memory_space<smem>>
    %100 = vector.broadcast %99 : f32 to vector<8x8xf32>
    %101 = arith.select %98, %100, %96 : vector<8x8xi1>, vector<8x8xf32>
    %c18_i32 = arith.constant 18 : i32
    %102 = vector.broadcast %c18_i32 : i32 to vector<8x8xi32>
    %103 = arith.cmpi eq, %5, %102 : vector<8x8xi32>
    %c72 = arith.constant 72 : index
    %104 = memref.load %arg2[%c72] : memref<128xf32, #tpu.memory_space<smem>>
    %105 = vector.broadcast %104 : f32 to vector<8x8xf32>
    %106 = arith.select %103, %105, %101 : vector<8x8xi1>, vector<8x8xf32>
    %c19_i32 = arith.constant 19 : i32
    %107 = vector.broadcast %c19_i32 : i32 to vector<8x8xi32>
    %108 = arith.cmpi eq, %5, %107 : vector<8x8xi32>
    %c76 = arith.constant 76 : index
    %109 = memref.load %arg2[%c76] : memref<128xf32, #tpu.memory_space<smem>>
    %110 = vector.broadcast %109 : f32 to vector<8x8xf32>
    %111 = arith.select %108, %110, %106 : vector<8x8xi1>, vector<8x8xf32>
    %c20_i32 = arith.constant 20 : i32
    %112 = vector.broadcast %c20_i32 : i32 to vector<8x8xi32>
    %113 = arith.cmpi eq, %5, %112 : vector<8x8xi32>
    %c80 = arith.constant 80 : index
    %114 = memref.load %arg2[%c80] : memref<128xf32, #tpu.memory_space<smem>>
    %115 = vector.broadcast %114 : f32 to vector<8x8xf32>
    %116 = arith.select %113, %115, %111 : vector<8x8xi1>, vector<8x8xf32>
    %c21_i32 = arith.constant 21 : i32
    %117 = vector.broadcast %c21_i32 : i32 to vector<8x8xi32>
    %118 = arith.cmpi eq, %5, %117 : vector<8x8xi32>
    %c84 = arith.constant 84 : index
    %119 = memref.load %arg2[%c84] : memref<128xf32, #tpu.memory_space<smem>>
    %120 = vector.broadcast %119 : f32 to vector<8x8xf32>
    %121 = arith.select %118, %120, %116 : vector<8x8xi1>, vector<8x8xf32>
    %c22_i32 = arith.constant 22 : i32
    %122 = vector.broadcast %c22_i32 : i32 to vector<8x8xi32>
    %123 = arith.cmpi eq, %5, %122 : vector<8x8xi32>
    %c88 = arith.constant 88 : index
    %124 = memref.load %arg2[%c88] : memref<128xf32, #tpu.memory_space<smem>>
    %125 = vector.broadcast %124 : f32 to vector<8x8xf32>
    %126 = arith.select %123, %125, %121 : vector<8x8xi1>, vector<8x8xf32>
    %c23_i32 = arith.constant 23 : i32
    %127 = vector.broadcast %c23_i32 : i32 to vector<8x8xi32>
    %128 = arith.cmpi eq, %5, %127 : vector<8x8xi32>
    %c92 = arith.constant 92 : index
    %129 = memref.load %arg2[%c92] : memref<128xf32, #tpu.memory_space<smem>>
    %130 = vector.broadcast %129 : f32 to vector<8x8xf32>
    %131 = arith.select %128, %130, %126 : vector<8x8xi1>, vector<8x8xf32>
    %c24_i32 = arith.constant 24 : i32
    %132 = vector.broadcast %c24_i32 : i32 to vector<8x8xi32>
    %133 = arith.cmpi eq, %5, %132 : vector<8x8xi32>
    %c96 = arith.constant 96 : index
    %134 = memref.load %arg2[%c96] : memref<128xf32, #tpu.memory_space<smem>>
    %135 = vector.broadcast %134 : f32 to vector<8x8xf32>
    %136 = arith.select %133, %135, %131 : vector<8x8xi1>, vector<8x8xf32>
    %c25_i32 = arith.constant 25 : i32
    %137 = vector.broadcast %c25_i32 : i32 to vector<8x8xi32>
    %138 = arith.cmpi eq, %5, %137 : vector<8x8xi32>
    %c100 = arith.constant 100 : index
    %139 = memref.load %arg2[%c100] : memref<128xf32, #tpu.memory_space<smem>>
    %140 = vector.broadcast %139 : f32 to vector<8x8xf32>
    %141 = arith.select %138, %140, %136 : vector<8x8xi1>, vector<8x8xf32>
    %c26_i32 = arith.constant 26 : i32
    %142 = vector.broadcast %c26_i32 : i32 to vector<8x8xi32>
    %143 = arith.cmpi eq, %5, %142 : vector<8x8xi32>
    %c104 = arith.constant 104 : index
    %144 = memref.load %arg2[%c104] : memref<128xf32, #tpu.memory_space<smem>>
    %145 = vector.broadcast %144 : f32 to vector<8x8xf32>
    %146 = arith.select %143, %145, %141 : vector<8x8xi1>, vector<8x8xf32>
    %c27_i32 = arith.constant 27 : i32
    %147 = vector.broadcast %c27_i32 : i32 to vector<8x8xi32>
    %148 = arith.cmpi eq, %5, %147 : vector<8x8xi32>
    %c108 = arith.constant 108 : index
    %149 = memref.load %arg2[%c108] : memref<128xf32, #tpu.memory_space<smem>>
    %150 = vector.broadcast %149 : f32 to vector<8x8xf32>
    %151 = arith.select %148, %150, %146 : vector<8x8xi1>, vector<8x8xf32>
    %c28_i32 = arith.constant 28 : i32
    %152 = vector.broadcast %c28_i32 : i32 to vector<8x8xi32>
    %153 = arith.cmpi eq, %5, %152 : vector<8x8xi32>
    %c112 = arith.constant 112 : index
    %154 = memref.load %arg2[%c112] : memref<128xf32, #tpu.memory_space<smem>>
    %155 = vector.broadcast %154 : f32 to vector<8x8xf32>
    %156 = arith.select %153, %155, %151 : vector<8x8xi1>, vector<8x8xf32>
    %c29_i32 = arith.constant 29 : i32
    %157 = vector.broadcast %c29_i32 : i32 to vector<8x8xi32>
    %158 = arith.cmpi eq, %5, %157 : vector<8x8xi32>
    %c116 = arith.constant 116 : index
    %159 = memref.load %arg2[%c116] : memref<128xf32, #tpu.memory_space<smem>>
    %160 = vector.broadcast %159 : f32 to vector<8x8xf32>
    %161 = arith.select %158, %160, %156 : vector<8x8xi1>, vector<8x8xf32>
    %c30_i32 = arith.constant 30 : i32
    %162 = vector.broadcast %c30_i32 : i32 to vector<8x8xi32>
    %163 = arith.cmpi eq, %5, %162 : vector<8x8xi32>
    %c120 = arith.constant 120 : index
    %164 = memref.load %arg2[%c120] : memref<128xf32, #tpu.memory_space<smem>>
    %165 = vector.broadcast %164 : f32 to vector<8x8xf32>
    %166 = arith.select %163, %165, %161 : vector<8x8xi1>, vector<8x8xf32>
    %c31_i32 = arith.constant 31 : i32
    %167 = vector.broadcast %c31_i32 : i32 to vector<8x8xi32>
    %168 = arith.cmpi eq, %5, %167 : vector<8x8xi32>
    %c124 = arith.constant 124 : index
    %169 = memref.load %arg2[%c124] : memref<128xf32, #tpu.memory_space<smem>>
    %170 = vector.broadcast %169 : f32 to vector<8x8xf32>
    %171 = arith.select %168, %170, %166 : vector<8x8xi1>, vector<8x8xf32>
    %172 = arith.addf %10, %171 : vector<8x8xf32>
    %cst_11 = arith.constant dense<0xFF800000> : vector<8xf32>
    %173 = vector.multi_reduction <maximumf>, %172, %cst_11 [1] : vector<8x8xf32> to vector<8xf32>
    %174 = vector.shape_cast %173 : vector<8xf32> to vector<8x1xf32>
    %175 = vector.broadcast %174 : vector<8x1xf32> to vector<8x8xf32>
    %176 = arith.subf %172, %175 : vector<8x8xf32>
    %177 = math.exp %176 : vector<8x8xf32>
    %cst_12 = arith.constant dense<0.000000e+00> : vector<8xf32>
    %178 = vector.multi_reduction <add>, %177, %cst_12 [1] : vector<8x8xf32> to vector<8xf32>
    %179 = vector.shape_cast %178 : vector<8xf32> to vector<8x1xf32>
    %180 = vector.broadcast %179 : vector<8x1xf32> to vector<8x8xf32>
    %181 = arith.divf %177, %180 : vector<8x8xf32>
    %182 = arith.truncf %181 : vector<8x8xf32> to vector<8x8xbf16>
    %cst_13 = arith.constant dense<0.000000e+00> : vector<8x8xf32>
    %183 = tpu.matmul %182, %9, %cst_13 {dimension_numbers = #tpu.dot_dimension_numbers<[1], [0], [0], [1], [0, 0, 1, 1], [], []>} : vector<8x8xbf16>, vector<8x8xbf16>, vector<8x8xf32> -> vector<8x8xf32>
    %c0_14 = arith.constant 0 : index
    %c0_15 = arith.constant 0 : index
    %184 = vector.load %arg9[%c0_14, %c0_15] : memref<8x32xf32, #tpu.memory_space<vmem>>, vector<8x8xf32>
    tpu.vector_store %arg9[%c0_14, %c0_15], %183 {strides = array<i32>} : memref<8x32xf32, #tpu.memory_space<vmem>>, vector<8x8xf32>,
    %185 = arith.index_cast %4 : i32 to index
    %c8_16 = arith.constant 8 : index
    %186 = vector.load %arg8[%185, %c8_16] : memref<8x96xbf16, #tpu.memory_space<vmem>>, vector<8x8xbf16>
    %c0_17 = arith.constant 0 : index
    %c40_18 = arith.constant 40 : index
    %187 = vector.load %arg8[%c0_17, %c40_18] : memref<8x96xbf16, #tpu.memory_space<vmem>>, vector<8x8xbf16>
    %c0_19 = arith.constant 0 : index
    %c72_20 = arith.constant 72 : index
    %188 = vector.load %arg8[%c0_19, %c72_20] : memref<8x96xbf16, #tpu.memory_space<vmem>>, vector<8x8xbf16>
    %cst_21 = arith.constant dense<0.000000e+00> : vector<8x8xf32>
    %189 = tpu.matmul %186, %187, %cst_21 {dimension_numbers = #tpu.dot_dimension_numbers<[1], [1], [0], [0], [0, 0, 1, 0], [], []>} : vector<8x8xbf16>, vector<8x8xbf16>, vector<8x8xf32> -> vector<8x8xf32>
    %cst_22 = arith.constant 0.000000e+00 : f32
    %190 = vector.broadcast %cst_22 : f32 to vector<8x8xf32>
    %c0_i32_23 = arith.constant 0 : i32
    %191 = vector.broadcast %c0_i32_23 : i32 to vector<8x8xi32>
    %192 = arith.cmpi eq, %5, %191 : vector<8x8xi32>
    %c1 = arith.constant 1 : index
    %193 = memref.load %arg2[%c1] : memref<128xf32, #tpu.memory_space<smem>>
    %194 = vector.broadcast %193 : f32 to vector<8x8xf32>
    %195 = arith.select %192, %194, %190 : vector<8x8xi1>, vector<8x8xf32>
    %c1_i32_24 = arith.constant 1 : i32
    %196 = vector.broadcast %c1_i32_24 : i32 to vector<8x8xi32>
    %197 = arith.cmpi eq, %5, %196 : vector<8x8xi32>
    %c5 = arith.constant 5 : index
    %198 = memref.load %arg2[%c5] : memref<128xf32, #tpu.memory_space<smem>>
    %199 = vector.broadcast %198 : f32 to vector<8x8xf32>
    %200 = arith.select %197, %199, %195 : vector<8x8xi1>, vector<8x8xf32>
    %c2_i32_25 = arith.constant 2 : i32
    %201 = vector.broadcast %c2_i32_25 : i32 to vector<8x8xi32>
    %202 = arith.cmpi eq, %5, %201 : vector<8x8xi32>
    %c9 = arith.constant 9 : index
    %203 = memref.load %arg2[%c9] : memref<128xf32, #tpu.memory_space<smem>>
    %204 = vector.broadcast %203 : f32 to vector<8x8xf32>
    %205 = arith.select %202, %204, %200 : vector<8x8xi1>, vector<8x8xf32>
    %c3_i32_26 = arith.constant 3 : i32
    %206 = vector.broadcast %c3_i32_26 : i32 to vector<8x8xi32>
    %207 = arith.cmpi eq, %5, %206 : vector<8x8xi32>
    %c13 = arith.constant 13 : index
    %208 = memref.load %arg2[%c13] : memref<128xf32, #tpu.memory_space<smem>>
    %209 = vector.broadcast %208 : f32 to vector<8x8xf32>
    %210 = arith.select %207, %209, %205 : vector<8x8xi1>, vector<8x8xf32>
    %c4_i32_27 = arith.constant 4 : i32
    %211 = vector.broadcast %c4_i32_27 : i32 to vector<8x8xi32>
    %212 = arith.cmpi eq, %5, %211 : vector<8x8xi32>
    %c17 = arith.constant 17 : index
    %213 = memref.load %arg2[%c17] : memref<128xf32, #tpu.memory_space<smem>>
    %214 = vector.broadcast %213 : f32 to vector<8x8xf32>
    %215 = arith.select %212, %214, %210 : vector<8x8xi1>, vector<8x8xf32>
    %c5_i32_28 = arith.constant 5 : i32
    %216 = vector.broadcast %c5_i32_28 : i32 to vector<8x8xi32>
    %217 = arith.cmpi eq, %5, %216 : vector<8x8xi32>
    %c21 = arith.constant 21 : index
    %218 = memref.load %arg2[%c21] : memref<128xf32, #tpu.memory_space<smem>>
    %219 = vector.broadcast %218 : f32 to vector<8x8xf32>
    %220 = arith.select %217, %219, %215 : vector<8x8xi1>, vector<8x8xf32>
    %c6_i32_29 = arith.constant 6 : i32
    %221 = vector.broadcast %c6_i32_29 : i32 to vector<8x8xi32>
    %222 = arith.cmpi eq, %5, %221 : vector<8x8xi32>
    %c25 = arith.constant 25 : index
    %223 = memref.load %arg2[%c25] : memref<128xf32, #tpu.memory_space<smem>>
    %224 = vector.broadcast %223 : f32 to vector<8x8xf32>
    %225 = arith.select %222, %224, %220 : vector<8x8xi1>, vector<8x8xf32>
    %c7_i32_30 = arith.constant 7 : i32
    %226 = vector.broadcast %c7_i32_30 : i32 to vector<8x8xi32>
    %227 = arith.cmpi eq, %5, %226 : vector<8x8xi32>
    %c29 = arith.constant 29 : index
    %228 = memref.load %arg2[%c29] : memref<128xf32, #tpu.memory_space<smem>>
    %229 = vector.broadcast %228 : f32 to vector<8x8xf32>
    %230 = arith.select %227, %229, %225 : vector<8x8xi1>, vector<8x8xf32>
    %c8_i32_31 = arith.constant 8 : i32
    %231 = vector.broadcast %c8_i32_31 : i32 to vector<8x8xi32>
    %232 = arith.cmpi eq, %5, %231 : vector<8x8xi32>
    %c33 = arith.constant 33 : index
    %233 = memref.load %arg2[%c33] : memref<128xf32, #tpu.memory_space<smem>>
    %234 = vector.broadcast %233 : f32 to vector<8x8xf32>
    %235 = arith.select %232, %234, %230 : vector<8x8xi1>, vector<8x8xf32>
    %c9_i32_32 = arith.constant 9 : i32
    %236 = vector.broadcast %c9_i32_32 : i32 to vector<8x8xi32>
    %237 = arith.cmpi eq, %5, %236 : vector<8x8xi32>
    %c37 = arith.constant 37 : index
    %238 = memref.load %arg2[%c37] : memref<128xf32, #tpu.memory_space<smem>>
    %239 = vector.broadcast %238 : f32 to vector<8x8xf32>
    %240 = arith.select %237, %239, %235 : vector<8x8xi1>, vector<8x8xf32>
    %c10_i32_33 = arith.constant 10 : i32
    %241 = vector.broadcast %c10_i32_33 : i32 to vector<8x8xi32>
    %242 = arith.cmpi eq, %5, %241 : vector<8x8xi32>
    %c41 = arith.constant 41 : index
    %243 = memref.load %arg2[%c41] : memref<128xf32, #tpu.memory_space<smem>>
    %244 = vector.broadcast %243 : f32 to vector<8x8xf32>
    %245 = arith.select %242, %244, %240 : vector<8x8xi1>, vector<8x8xf32>
    %c11_i32_34 = arith.constant 11 : i32
    %246 = vector.broadcast %c11_i32_34 : i32 to vector<8x8xi32>
    %247 = arith.cmpi eq, %5, %246 : vector<8x8xi32>
    %c45 = arith.constant 45 : index
    %248 = memref.load %arg2[%c45] : memref<128xf32, #tpu.memory_space<smem>>
    %249 = vector.broadcast %248 : f32 to vector<8x8xf32>
    %250 = arith.select %247, %249, %245 : vector<8x8xi1>, vector<8x8xf32>
    %c12_i32_35 = arith.constant 12 : i32
    %251 = vector.broadcast %c12_i32_35 : i32 to vector<8x8xi32>
    %252 = arith.cmpi eq, %5, %251 : vector<8x8xi32>
    %c49 = arith.constant 49 : index
    %253 = memref.load %arg2[%c49] : memref<128xf32, #tpu.memory_space<smem>>
    %254 = vector.broadcast %253 : f32 to vector<8x8xf32>
    %255 = arith.select %252, %254, %250 : vector<8x8xi1>, vector<8x8xf32>
    %c13_i32_36 = arith.constant 13 : i32
    %256 = vector.broadcast %c13_i32_36 : i32 to vector<8x8xi32>
    %257 = arith.cmpi eq, %5, %256 : vector<8x8xi32>
    %c53 = arith.constant 53 : index
    %258 = memref.load %arg2[%c53] : memref<128xf32, #tpu.memory_space<smem>>
    %259 = vector.broadcast %258 : f32 to vector<8x8xf32>
    %260 = arith.select %257, %259, %255 : vector<8x8xi1>, vector<8x8xf32>
    %c14_i32_37 = arith.constant 14 : i32
    %261 = vector.broadcast %c14_i32_37 : i32 to vector<8x8xi32>
    %262 = arith.cmpi eq, %5, %261 : vector<8x8xi32>
    %c57 = arith.constant 57 : index
    %263 = memref.load %arg2[%c57] : memref<128xf32, #tpu.memory_space<smem>>
    %264 = vector.broadcast %263 : f32 to vector<8x8xf32>
    %265 = arith.select %262, %264, %260 : vector<8x8xi1>, vector<8x8xf32>
    %c15_i32_38 = arith.constant 15 : i32
    %266 = vector.broadcast %c15_i32_38 : i32 to vector<8x8xi32>
    %267 = arith.cmpi eq, %5, %266 : vector<8x8xi32>
    %c61 = arith.constant 61 : index
    %268 = memref.load %arg2[%c61] : memref<128xf32, #tpu.memory_space<smem>>
    %269 = vector.broadcast %268 : f32 to vector<8x8xf32>
    %270 = arith.select %267, %269, %265 : vector<8x8xi1>, vector<8x8xf32>
    %c16_i32_39 = arith.constant 16 : i32
    %271 = vector.broadcast %c16_i32_39 : i32 to vector<8x8xi32>
    %272 = arith.cmpi eq, %5, %271 : vector<8x8xi32>
    %c65 = arith.constant 65 : index
    %273 = memref.load %arg2[%c65] : memref<128xf32, #tpu.memory_space<smem>>
    %274 = vector.broadcast %273 : f32 to vector<8x8xf32>
    %275 = arith.select %272, %274, %270 : vector<8x8xi1>, vector<8x8xf32>
    %c17_i32_40 = arith.constant 17 : i32
    %276 = vector.broadcast %c17_i32_40 : i32 to vector<8x8xi32>
    %277 = arith.cmpi eq, %5, %276 : vector<8x8xi32>
    %c69 = arith.constant 69 : index
    %278 = memref.load %arg2[%c69] : memref<128xf32, #tpu.memory_space<smem>>
    %279 = vector.broadcast %278 : f32 to vector<8x8xf32>
    %280 = arith.select %277, %279, %275 : vector<8x8xi1>, vector<8x8xf32>
    %c18_i32_41 = arith.constant 18 : i32
    %281 = vector.broadcast %c18_i32_41 : i32 to vector<8x8xi32>
    %282 = arith.cmpi eq, %5, %281 : vector<8x8xi32>
    %c73 = arith.constant 73 : index
    %283 = memref.load %arg2[%c73] : memref<128xf32, #tpu.memory_space<smem>>
    %284 = vector.broadcast %283 : f32 to vector<8x8xf32>
    %285 = arith.select %282, %284, %280 : vector<8x8xi1>, vector<8x8xf32>
    %c19_i32_42 = arith.constant 19 : i32
    %286 = vector.broadcast %c19_i32_42 : i32 to vector<8x8xi32>
    %287 = arith.cmpi eq, %5, %286 : vector<8x8xi32>
    %c77 = arith.constant 77 : index
    %288 = memref.load %arg2[%c77] : memref<128xf32, #tpu.memory_space<smem>>
    %289 = vector.broadcast %288 : f32 to vector<8x8xf32>
    %290 = arith.select %287, %289, %285 : vector<8x8xi1>, vector<8x8xf32>
    %c20_i32_43 = arith.constant 20 : i32
    %291 = vector.broadcast %c20_i32_43 : i32 to vector<8x8xi32>
    %292 = arith.cmpi eq, %5, %291 : vector<8x8xi32>
    %c81 = arith.constant 81 : index
    %293 = memref.load %arg2[%c81] : memref<128xf32, #tpu.memory_space<smem>>
    %294 = vector.broadcast %293 : f32 to vector<8x8xf32>
    %295 = arith.select %292, %294, %290 : vector<8x8xi1>, vector<8x8xf32>
    %c21_i32_44 = arith.constant 21 : i32
    %296 = vector.broadcast %c21_i32_44 : i32 to vector<8x8xi32>
    %297 = arith.cmpi eq, %5, %296 : vector<8x8xi32>
    %c85 = arith.constant 85 : index
    %298 = memref.load %arg2[%c85] : memref<128xf32, #tpu.memory_space<smem>>
    %299 = vector.broadcast %298 : f32 to vector<8x8xf32>
    %300 = arith.select %297, %299, %295 : vector<8x8xi1>, vector<8x8xf32>
    %c22_i32_45 = arith.constant 22 : i32
    %301 = vector.broadcast %c22_i32_45 : i32 to vector<8x8xi32>
    %302 = arith.cmpi eq, %5, %301 : vector<8x8xi32>
    %c89 = arith.constant 89 : index
    %303 = memref.load %arg2[%c89] : memref<128xf32, #tpu.memory_space<smem>>
    %304 = vector.broadcast %303 : f32 to vector<8x8xf32>
    %305 = arith.select %302, %304, %300 : vector<8x8xi1>, vector<8x8xf32>
    %c23_i32_46 = arith.constant 23 : i32
    %306 = vector.broadcast %c23_i32_46 : i32 to vector<8x8xi32>
    %307 = arith.cmpi eq, %5, %306 : vector<8x8xi32>
    %c93 = arith.constant 93 : index
    %308 = memref.load %arg2[%c93] : memref<128xf32, #tpu.memory_space<smem>>
    %309 = vector.broadcast %308 : f32 to vector<8x8xf32>
    %310 = arith.select %307, %309, %305 : vector<8x8xi1>, vector<8x8xf32>
    %c24_i32_47 = arith.constant 24 : i32
    %311 = vector.broadcast %c24_i32_47 : i32 to vector<8x8xi32>
    %312 = arith.cmpi eq, %5, %311 : vector<8x8xi32>
    %c97 = arith.constant 97 : index
    %313 = memref.load %arg2[%c97] : memref<128xf32, #tpu.memory_space<smem>>
    %314 = vector.broadcast %313 : f32 to vector<8x8xf32>
    %315 = arith.select %312, %314, %310 : vector<8x8xi1>, vector<8x8xf32>
    %c25_i32_48 = arith.constant 25 : i32
    %316 = vector.broadcast %c25_i32_48 : i32 to vector<8x8xi32>
    %317 = arith.cmpi eq, %5, %316 : vector<8x8xi32>
    %c101 = arith.constant 101 : index
    %318 = memref.load %arg2[%c101] : memref<128xf32, #tpu.memory_space<smem>>
    %319 = vector.broadcast %318 : f32 to vector<8x8xf32>
    %320 = arith.select %317, %319, %315 : vector<8x8xi1>, vector<8x8xf32>
    %c26_i32_49 = arith.constant 26 : i32
    %321 = vector.broadcast %c26_i32_49 : i32 to vector<8x8xi32>
    %322 = arith.cmpi eq, %5, %321 : vector<8x8xi32>
    %c105 = arith.constant 105 : index
    %323 = memref.load %arg2[%c105] : memref<128xf32, #tpu.memory_space<smem>>
    %324 = vector.broadcast %323 : f32 to vector<8x8xf32>
    %325 = arith.select %322, %324, %320 : vector<8x8xi1>, vector<8x8xf32>
    %c27_i32_50 = arith.constant 27 : i32
    %326 = vector.broadcast %c27_i32_50 : i32 to vector<8x8xi32>
    %327 = arith.cmpi eq, %5, %326 : vector<8x8xi32>
    %c109 = arith.constant 109 : index
    %328 = memref.load %arg2[%c109] : memref<128xf32, #tpu.memory_space<smem>>
    %329 = vector.broadcast %328 : f32 to vector<8x8xf32>
    %330 = arith.select %327, %329, %325 : vector<8x8xi1>, vector<8x8xf32>
    %c28_i32_51 = arith.constant 28 : i32
    %331 = vector.broadcast %c28_i32_51 : i32 to vector<8x8xi32>
    %332 = arith.cmpi eq, %5, %331 : vector<8x8xi32>
    %c113 = arith.constant 113 : index
    %333 = memref.load %arg2[%c113] : memref<128xf32, #tpu.memory_space<smem>>
    %334 = vector.broadcast %333 : f32 to vector<8x8xf32>
    %335 = arith.select %332, %334, %330 : vector<8x8xi1>, vector<8x8xf32>
    %c29_i32_52 = arith.constant 29 : i32
    %336 = vector.broadcast %c29_i32_52 : i32 to vector<8x8xi32>
    %337 = arith.cmpi eq, %5, %336 : vector<8x8xi32>
    %c117 = arith.constant 117 : index
    %338 = memref.load %arg2[%c117] : memref<128xf32, #tpu.memory_space<smem>>
    %339 = vector.broadcast %338 : f32 to vector<8x8xf32>
    %340 = arith.select %337, %339, %335 : vector<8x8xi1>, vector<8x8xf32>
    %c30_i32_53 = arith.constant 30 : i32
    %341 = vector.broadcast %c30_i32_53 : i32 to vector<8x8xi32>
    %342 = arith.cmpi eq, %5, %341 : vector<8x8xi32>
    %c121 = arith.constant 121 : index
    %343 = memref.load %arg2[%c121] : memref<128xf32, #tpu.memory_space<smem>>
    %344 = vector.broadcast %343 : f32 to vector<8x8xf32>
    %345 = arith.select %342, %344, %340 : vector<8x8xi1>, vector<8x8xf32>
    %c31_i32_54 = arith.constant 31 : i32
    %346 = vector.broadcast %c31_i32_54 : i32 to vector<8x8xi32>
    %347 = arith.cmpi eq, %5, %346 : vector<8x8xi32>
    %c125 = arith.constant 125 : index
    %348 = memref.load %arg2[%c125] : memref<128xf32, #tpu.memory_space<smem>>
    %349 = vector.broadcast %348 : f32 to vector<8x8xf32>
    %350 = arith.select %347, %349, %345 : vector<8x8xi1>, vector<8x8xf32>
    %351 = arith.addf %189, %350 : vector<8x8xf32>
    %cst_55 = arith.constant dense<0xFF800000> : vector<8xf32>
    %352 = vector.multi_reduction <maximumf>, %351, %cst_55 [1] : vector<8x8xf32> to vector<8xf32>
    %353 = vector.shape_cast %352 : vector<8xf32> to vector<8x1xf32>
    %354 = vector.broadcast %353 : vector<8x1xf32> to vector<8x8xf32>
    %355 = arith.subf %351, %354 : vector<8x8xf32>
    %356 = math.exp %355 : vector<8x8xf32>
    %cst_56 = arith.constant dense<0.000000e+00> : vector<8xf32>
    %357 = vector.multi_reduction <add>, %356, %cst_56 [1] : vector<8x8xf32> to vector<8xf32>
    %358 = vector.shape_cast %357 : vector<8xf32> to vector<8x1xf32>
    %359 = vector.broadcast %358 : vector<8x1xf32> to vector<8x8xf32>
    %360 = arith.divf %356, %359 : vector<8x8xf32>
    %361 = arith.truncf %360 : vector<8x8xf32> to vector<8x8xbf16>
    %cst_57 = arith.constant dense<0.000000e+00> : vector<8x8xf32>
    %362 = tpu.matmul %361, %188, %cst_57 {dimension_numbers = #tpu.dot_dimension_numbers<[1], [0], [0], [1], [0, 0, 1, 1], [], []>} : vector<8x8xbf16>, vector<8x8xbf16>, vector<8x8xf32> -> vector<8x8xf32>
    %c0_58 = arith.constant 0 : index
    %c8_59 = arith.constant 8 : index
    %363 = vector.load %arg9[%c0_58, %c8_59] : memref<8x32xf32, #tpu.memory_space<vmem>>, vector<8x8xf32>
    tpu.vector_store %arg9[%c0_58, %c8_59], %362 {strides = array<i32>} : memref<8x32xf32, #tpu.memory_space<vmem>>, vector<8x8xf32>,
    %364 = arith.index_cast %4 : i32 to index
    %c16_60 = arith.constant 16 : index
    %365 = vector.load %arg8[%364, %c16_60] : memref<8x96xbf16, #tpu.memory_space<vmem>>, vector<8x8xbf16>
    %c0_61 = arith.constant 0 : index
    %c48_62 = arith.constant 48 : index
    %366 = vector.load %arg8[%c0_61, %c48_62] : memref<8x96xbf16, #tpu.memory_space<vmem>>, vector<8x8xbf16>
    %c0_63 = arith.constant 0 : index
    %c80_64 = arith.constant 80 : index
    %367 = vector.load %arg8[%c0_63, %c80_64] : memref<8x96xbf16, #tpu.memory_space<vmem>>, vector<8x8xbf16>
    %cst_65 = arith.constant dense<0.000000e+00> : vector<8x8xf32>
    %368 = tpu.matmul %365, %366, %cst_65 {dimension_numbers = #tpu.dot_dimension_numbers<[1], [1], [0], [0], [0, 0, 1, 0], [], []>} : vector<8x8xbf16>, vector<8x8xbf16>, vector<8x8xf32> -> vector<8x8xf32>
    %cst_66 = arith.constant 0.000000e+00 : f32
    %369 = vector.broadcast %cst_66 : f32 to vector<8x8xf32>
    %c0_i32_67 = arith.constant 0 : i32
    %370 = vector.broadcast %c0_i32_67 : i32 to vector<8x8xi32>
    %371 = arith.cmpi eq, %5, %370 : vector<8x8xi32>
    %c2 = arith.constant 2 : index
    %372 = memref.load %arg2[%c2] : memref<128xf32, #tpu.memory_space<smem>>
    %373 = vector.broadcast %372 : f32 to vector<8x8xf32>
    %374 = arith.select %371, %373, %369 : vector<8x8xi1>, vector<8x8xf32>
    %c1_i32_68 = arith.constant 1 : i32
    %375 = vector.broadcast %c1_i32_68 : i32 to vector<8x8xi32>
    %376 = arith.cmpi eq, %5, %375 : vector<8x8xi32>
    %c6 = arith.constant 6 : index
    %377 = memref.load %arg2[%c6] : memref<128xf32, #tpu.memory_space<smem>>
    %378 = vector.broadcast %377 : f32 to vector<8x8xf32>
    %379 = arith.select %376, %378, %374 : vector<8x8xi1>, vector<8x8xf32>
    %c2_i32_69 = arith.constant 2 : i32
    %380 = vector.broadcast %c2_i32_69 : i32 to vector<8x8xi32>
    %381 = arith.cmpi eq, %5, %380 : vector<8x8xi32>
    %c10 = arith.constant 10 : index
    %382 = memref.load %arg2[%c10] : memref<128xf32, #tpu.memory_space<smem>>
    %383 = vector.broadcast %382 : f32 to vector<8x8xf32>
    %384 = arith.select %381, %383, %379 : vector<8x8xi1>, vector<8x8xf32>
    %c3_i32_70 = arith.constant 3 : i32
    %385 = vector.broadcast %c3_i32_70 : i32 to vector<8x8xi32>
    %386 = arith.cmpi eq, %5, %385 : vector<8x8xi32>
    %c14 = arith.constant 14 : index
    %387 = memref.load %arg2[%c14] : memref<128xf32, #tpu.memory_space<smem>>
    %388 = vector.broadcast %387 : f32 to vector<8x8xf32>
    %389 = arith.select %386, %388, %384 : vector<8x8xi1>, vector<8x8xf32>
    %c4_i32_71 = arith.constant 4 : i32
    %390 = vector.broadcast %c4_i32_71 : i32 to vector<8x8xi32>
    %391 = arith.cmpi eq, %5, %390 : vector<8x8xi32>
    %c18 = arith.constant 18 : index
    %392 = memref.load %arg2[%c18] : memref<128xf32, #tpu.memory_space<smem>>
    %393 = vector.broadcast %392 : f32 to vector<8x8xf32>
    %394 = arith.select %391, %393, %389 : vector<8x8xi1>, vector<8x8xf32>
    %c5_i32_72 = arith.constant 5 : i32
    %395 = vector.broadcast %c5_i32_72 : i32 to vector<8x8xi32>
    %396 = arith.cmpi eq, %5, %395 : vector<8x8xi32>
    %c22 = arith.constant 22 : index
    %397 = memref.load %arg2[%c22] : memref<128xf32, #tpu.memory_space<smem>>
    %398 = vector.broadcast %397 : f32 to vector<8x8xf32>
    %399 = arith.select %396, %398, %394 : vector<8x8xi1>, vector<8x8xf32>
    %c6_i32_73 = arith.constant 6 : i32
    %400 = vector.broadcast %c6_i32_73 : i32 to vector<8x8xi32>
    %401 = arith.cmpi eq, %5, %400 : vector<8x8xi32>
    %c26 = arith.constant 26 : index
    %402 = memref.load %arg2[%c26] : memref<128xf32, #tpu.memory_space<smem>>
    %403 = vector.broadcast %402 : f32 to vector<8x8xf32>
    %404 = arith.select %401, %403, %399 : vector<8x8xi1>, vector<8x8xf32>
    %c7_i32_74 = arith.constant 7 : i32
    %405 = vector.broadcast %c7_i32_74 : i32 to vector<8x8xi32>
    %406 = arith.cmpi eq, %5, %405 : vector<8x8xi32>
    %c30 = arith.constant 30 : index
    %407 = memref.load %arg2[%c30] : memref<128xf32, #tpu.memory_space<smem>>
    %408 = vector.broadcast %407 : f32 to vector<8x8xf32>
    %409 = arith.select %406, %408, %404 : vector<8x8xi1>, vector<8x8xf32>
    %c8_i32_75 = arith.constant 8 : i32
    %410 = vector.broadcast %c8_i32_75 : i32 to vector<8x8xi32>
    %411 = arith.cmpi eq, %5, %410 : vector<8x8xi32>
    %c34 = arith.constant 34 : index
    %412 = memref.load %arg2[%c34] : memref<128xf32, #tpu.memory_space<smem>>
    %413 = vector.broadcast %412 : f32 to vector<8x8xf32>
    %414 = arith.select %411, %413, %409 : vector<8x8xi1>, vector<8x8xf32>
    %c9_i32_76 = arith.constant 9 : i32
    %415 = vector.broadcast %c9_i32_76 : i32 to vector<8x8xi32>
    %416 = arith.cmpi eq, %5, %415 : vector<8x8xi32>
    %c38 = arith.constant 38 : index
    %417 = memref.load %arg2[%c38] : memref<128xf32, #tpu.memory_space<smem>>
    %418 = vector.broadcast %417 : f32 to vector<8x8xf32>
    %419 = arith.select %416, %418, %414 : vector<8x8xi1>, vector<8x8xf32>
    %c10_i32_77 = arith.constant 10 : i32
    %420 = vector.broadcast %c10_i32_77 : i32 to vector<8x8xi32>
    %421 = arith.cmpi eq, %5, %420 : vector<8x8xi32>
    %c42 = arith.constant 42 : index
    %422 = memref.load %arg2[%c42] : memref<128xf32, #tpu.memory_space<smem>>
    %423 = vector.broadcast %422 : f32 to vector<8x8xf32>
    %424 = arith.select %421, %423, %419 : vector<8x8xi1>, vector<8x8xf32>
    %c11_i32_78 = arith.constant 11 : i32
    %425 = vector.broadcast %c11_i32_78 : i32 to vector<8x8xi32>
    %426 = arith.cmpi eq, %5, %425 : vector<8x8xi32>
    %c46 = arith.constant 46 : index
    %427 = memref.load %arg2[%c46] : memref<128xf32, #tpu.memory_space<smem>>
    %428 = vector.broadcast %427 : f32 to vector<8x8xf32>
    %429 = arith.select %426, %428, %424 : vector<8x8xi1>, vector<8x8xf32>
    %c12_i32_79 = arith.constant 12 : i32
    %430 = vector.broadcast %c12_i32_79 : i32 to vector<8x8xi32>
    %431 = arith.cmpi eq, %5, %430 : vector<8x8xi32>
    %c50 = arith.constant 50 : index
    %432 = memref.load %arg2[%c50] : memref<128xf32, #tpu.memory_space<smem>>
    %433 = vector.broadcast %432 : f32 to vector<8x8xf32>
    %434 = arith.select %431, %433, %429 : vector<8x8xi1>, vector<8x8xf32>
    %c13_i32_80 = arith.constant 13 : i32
    %435 = vector.broadcast %c13_i32_80 : i32 to vector<8x8xi32>
    %436 = arith.cmpi eq, %5, %435 : vector<8x8xi32>
    %c54 = arith.constant 54 : index
    %437 = memref.load %arg2[%c54] : memref<128xf32, #tpu.memory_space<smem>>
    %438 = vector.broadcast %437 : f32 to vector<8x8xf32>
    %439 = arith.select %436, %438, %434 : vector<8x8xi1>, vector<8x8xf32>
    %c14_i32_81 = arith.constant 14 : i32
    %440 = vector.broadcast %c14_i32_81 : i32 to vector<8x8xi32>
    %441 = arith.cmpi eq, %5, %440 : vector<8x8xi32>
    %c58 = arith.constant 58 : index
    %442 = memref.load %arg2[%c58] : memref<128xf32, #tpu.memory_space<smem>>
    %443 = vector.broadcast %442 : f32 to vector<8x8xf32>
    %444 = arith.select %441, %443, %439 : vector<8x8xi1>, vector<8x8xf32>
    %c15_i32_82 = arith.constant 15 : i32
    %445 = vector.broadcast %c15_i32_82 : i32 to vector<8x8xi32>
    %446 = arith.cmpi eq, %5, %445 : vector<8x8xi32>
    %c62 = arith.constant 62 : index
    %447 = memref.load %arg2[%c62] : memref<128xf32, #tpu.memory_space<smem>>
    %448 = vector.broadcast %447 : f32 to vector<8x8xf32>
    %449 = arith.select %446, %448, %444 : vector<8x8xi1>, vector<8x8xf32>
    %c16_i32_83 = arith.constant 16 : i32
    %450 = vector.broadcast %c16_i32_83 : i32 to vector<8x8xi32>
    %451 = arith.cmpi eq, %5, %450 : vector<8x8xi32>
    %c66 = arith.constant 66 : index
    %452 = memref.load %arg2[%c66] : memref<128xf32, #tpu.memory_space<smem>>
    %453 = vector.broadcast %452 : f32 to vector<8x8xf32>
    %454 = arith.select %451, %453, %449 : vector<8x8xi1>, vector<8x8xf32>
    %c17_i32_84 = arith.constant 17 : i32
    %455 = vector.broadcast %c17_i32_84 : i32 to vector<8x8xi32>
    %456 = arith.cmpi eq, %5, %455 : vector<8x8xi32>
    %c70 = arith.constant 70 : index
    %457 = memref.load %arg2[%c70] : memref<128xf32, #tpu.memory_space<smem>>
    %458 = vector.broadcast %457 : f32 to vector<8x8xf32>
    %459 = arith.select %456, %458, %454 : vector<8x8xi1>, vector<8x8xf32>
    %c18_i32_85 = arith.constant 18 : i32
    %460 = vector.broadcast %c18_i32_85 : i32 to vector<8x8xi32>
    %461 = arith.cmpi eq, %5, %460 : vector<8x8xi32>
    %c74 = arith.constant 74 : index
    %462 = memref.load %arg2[%c74] : memref<128xf32, #tpu.memory_space<smem>>
    %463 = vector.broadcast %462 : f32 to vector<8x8xf32>
    %464 = arith.select %461, %463, %459 : vector<8x8xi1>, vector<8x8xf32>
    %c19_i32_86 = arith.constant 19 : i32
    %465 = vector.broadcast %c19_i32_86 : i32 to vector<8x8xi32>
    %466 = arith.cmpi eq, %5, %465 : vector<8x8xi32>
    %c78 = arith.constant 78 : index
    %467 = memref.load %arg2[%c78] : memref<128xf32, #tpu.memory_space<smem>>
    %468 = vector.broadcast %467 : f32 to vector<8x8xf32>
    %469 = arith.select %466, %468, %464 : vector<8x8xi1>, vector<8x8xf32>
    %c20_i32_87 = arith.constant 20 : i32
    %470 = vector.broadcast %c20_i32_87 : i32 to vector<8x8xi32>
    %471 = arith.cmpi eq, %5, %470 : vector<8x8xi32>
    %c82 = arith.constant 82 : index
    %472 = memref.load %arg2[%c82] : memref<128xf32, #tpu.memory_space<smem>>
    %473 = vector.broadcast %472 : f32 to vector<8x8xf32>
    %474 = arith.select %471, %473, %469 : vector<8x8xi1>, vector<8x8xf32>
    %c21_i32_88 = arith.constant 21 : i32
    %475 = vector.broadcast %c21_i32_88 : i32 to vector<8x8xi32>
    %476 = arith.cmpi eq, %5, %475 : vector<8x8xi32>
    %c86 = arith.constant 86 : index
    %477 = memref.load %arg2[%c86] : memref<128xf32, #tpu.memory_space<smem>>
    %478 = vector.broadcast %477 : f32 to vector<8x8xf32>
    %479 = arith.select %476, %478, %474 : vector<8x8xi1>, vector<8x8xf32>
    %c22_i32_89 = arith.constant 22 : i32
    %480 = vector.broadcast %c22_i32_89 : i32 to vector<8x8xi32>
    %481 = arith.cmpi eq, %5, %480 : vector<8x8xi32>
    %c90 = arith.constant 90 : index
    %482 = memref.load %arg2[%c90] : memref<128xf32, #tpu.memory_space<smem>>
    %483 = vector.broadcast %482 : f32 to vector<8x8xf32>
    %484 = arith.select %481, %483, %479 : vector<8x8xi1>, vector<8x8xf32>
    %c23_i32_90 = arith.constant 23 : i32
    %485 = vector.broadcast %c23_i32_90 : i32 to vector<8x8xi32>
    %486 = arith.cmpi eq, %5, %485 : vector<8x8xi32>
    %c94 = arith.constant 94 : index
    %487 = memref.load %arg2[%c94] : memref<128xf32, #tpu.memory_space<smem>>
    %488 = vector.broadcast %487 : f32 to vector<8x8xf32>
    %489 = arith.select %486, %488, %484 : vector<8x8xi1>, vector<8x8xf32>
    %c24_i32_91 = arith.constant 24 : i32
    %490 = vector.broadcast %c24_i32_91 : i32 to vector<8x8xi32>
    %491 = arith.cmpi eq, %5, %490 : vector<8x8xi32>
    %c98 = arith.constant 98 : index
    %492 = memref.load %arg2[%c98] : memref<128xf32, #tpu.memory_space<smem>>
    %493 = vector.broadcast %492 : f32 to vector<8x8xf32>
    %494 = arith.select %491, %493, %489 : vector<8x8xi1>, vector<8x8xf32>
    %c25_i32_92 = arith.constant 25 : i32
    %495 = vector.broadcast %c25_i32_92 : i32 to vector<8x8xi32>
    %496 = arith.cmpi eq, %5, %495 : vector<8x8xi32>
    %c102 = arith.constant 102 : index
    %497 = memref.load %arg2[%c102] : memref<128xf32, #tpu.memory_space<smem>>
    %498 = vector.broadcast %497 : f32 to vector<8x8xf32>
    %499 = arith.select %496, %498, %494 : vector<8x8xi1>, vector<8x8xf32>
    %c26_i32_93 = arith.constant 26 : i32
    %500 = vector.broadcast %c26_i32_93 : i32 to vector<8x8xi32>
    %501 = arith.cmpi eq, %5, %500 : vector<8x8xi32>
    %c106 = arith.constant 106 : index
    %502 = memref.load %arg2[%c106] : memref<128xf32, #tpu.memory_space<smem>>
    %503 = vector.broadcast %502 : f32 to vector<8x8xf32>
    %504 = arith.select %501, %503, %499 : vector<8x8xi1>, vector<8x8xf32>
    %c27_i32_94 = arith.constant 27 : i32
    %505 = vector.broadcast %c27_i32_94 : i32 to vector<8x8xi32>
    %506 = arith.cmpi eq, %5, %505 : vector<8x8xi32>
    %c110 = arith.constant 110 : index
    %507 = memref.load %arg2[%c110] : memref<128xf32, #tpu.memory_space<smem>>
    %508 = vector.broadcast %507 : f32 to vector<8x8xf32>
    %509 = arith.select %506, %508, %504 : vector<8x8xi1>, vector<8x8xf32>
    %c28_i32_95 = arith.constant 28 : i32
    %510 = vector.broadcast %c28_i32_95 : i32 to vector<8x8xi32>
    %511 = arith.cmpi eq, %5, %510 : vector<8x8xi32>
    %c114 = arith.constant 114 : index
    %512 = memref.load %arg2[%c114] : memref<128xf32, #tpu.memory_space<smem>>
    %513 = vector.broadcast %512 : f32 to vector<8x8xf32>
    %514 = arith.select %511, %513, %509 : vector<8x8xi1>, vector<8x8xf32>
    %c29_i32_96 = arith.constant 29 : i32
    %515 = vector.broadcast %c29_i32_96 : i32 to vector<8x8xi32>
    %516 = arith.cmpi eq, %5, %515 : vector<8x8xi32>
    %c118 = arith.constant 118 : index
    %517 = memref.load %arg2[%c118] : memref<128xf32, #tpu.memory_space<smem>>
    %518 = vector.broadcast %517 : f32 to vector<8x8xf32>
    %519 = arith.select %516, %518, %514 : vector<8x8xi1>, vector<8x8xf32>
    %c30_i32_97 = arith.constant 30 : i32
    %520 = vector.broadcast %c30_i32_97 : i32 to vector<8x8xi32>
    %521 = arith.cmpi eq, %5, %520 : vector<8x8xi32>
    %c122 = arith.constant 122 : index
    %522 = memref.load %arg2[%c122] : memref<128xf32, #tpu.memory_space<smem>>
    %523 = vector.broadcast %522 : f32 to vector<8x8xf32>
    %524 = arith.select %521, %523, %519 : vector<8x8xi1>, vector<8x8xf32>
    %c31_i32_98 = arith.constant 31 : i32
    %525 = vector.broadcast %c31_i32_98 : i32 to vector<8x8xi32>
    %526 = arith.cmpi eq, %5, %525 : vector<8x8xi32>
    %c126 = arith.constant 126 : index
    %527 = memref.load %arg2[%c126] : memref<128xf32, #tpu.memory_space<smem>>
    %528 = vector.broadcast %527 : f32 to vector<8x8xf32>
    %529 = arith.select %526, %528, %524 : vector<8x8xi1>, vector<8x8xf32>
    %530 = arith.addf %368, %529 : vector<8x8xf32>
    %cst_99 = arith.constant dense<0xFF800000> : vector<8xf32>
    %531 = vector.multi_reduction <maximumf>, %530, %cst_99 [1] : vector<8x8xf32> to vector<8xf32>
    %532 = vector.shape_cast %531 : vector<8xf32> to vector<8x1xf32>
    %533 = vector.broadcast %532 : vector<8x1xf32> to vector<8x8xf32>
    %534 = arith.subf %530, %533 : vector<8x8xf32>
    %535 = math.exp %534 : vector<8x8xf32>
    %cst_100 = arith.constant dense<0.000000e+00> : vector<8xf32>
    %536 = vector.multi_reduction <add>, %535, %cst_100 [1] : vector<8x8xf32> to vector<8xf32>
    %537 = vector.shape_cast %536 : vector<8xf32> to vector<8x1xf32>
    %538 = vector.broadcast %537 : vector<8x1xf32> to vector<8x8xf32>
    %539 = arith.divf %535, %538 : vector<8x8xf32>
    %540 = arith.truncf %539 : vector<8x8xf32> to vector<8x8xbf16>
    %cst_101 = arith.constant dense<0.000000e+00> : vector<8x8xf32>
    %541 = tpu.matmul %540, %367, %cst_101 {dimension_numbers = #tpu.dot_dimension_numbers<[1], [0], [0], [1], [0, 0, 1, 1], [], []>} : vector<8x8xbf16>, vector<8x8xbf16>, vector<8x8xf32> -> vector<8x8xf32>
    %c0_102 = arith.constant 0 : index
    %c16_103 = arith.constant 16 : index
    %542 = vector.load %arg9[%c0_102, %c16_103] : memref<8x32xf32, #tpu.memory_space<vmem>>, vector<8x8xf32>
    tpu.vector_store %arg9[%c0_102, %c16_103], %541 {strides = array<i32>} : memref<8x32xf32, #tpu.memory_space<vmem>>, vector<8x8xf32>,
    %543 = arith.index_cast %4 : i32 to index
    %c24_104 = arith.constant 24 : index
    %544 = vector.load %arg8[%543, %c24_104] : memref<8x96xbf16, #tpu.memory_space<vmem>>, vector<8x8xbf16>
    %c0_105 = arith.constant 0 : index
    %c56_106 = arith.constant 56 : index
    %545 = vector.load %arg8[%c0_105, %c56_106] : memref<8x96xbf16, #tpu.memory_space<vmem>>, vector<8x8xbf16>
    %c0_107 = arith.constant 0 : index
    %c88_108 = arith.constant 88 : index
    %546 = vector.load %arg8[%c0_107, %c88_108] : memref<8x96xbf16, #tpu.memory_space<vmem>>, vector<8x8xbf16>
    %cst_109 = arith.constant dense<0.000000e+00> : vector<8x8xf32>
    %547 = tpu.matmul %544, %545, %cst_109 {dimension_numbers = #tpu.dot_dimension_numbers<[1], [1], [0], [0], [0, 0, 1, 0], [], []>} : vector<8x8xbf16>, vector<8x8xbf16>, vector<8x8xf32> -> vector<8x8xf32>
    %cst_110 = arith.constant 0.000000e+00 : f32
    %548 = vector.broadcast %cst_110 : f32 to vector<8x8xf32>
    %c0_i32_111 = arith.constant 0 : i32
    %549 = vector.broadcast %c0_i32_111 : i32 to vector<8x8xi32>
    %550 = arith.cmpi eq, %5, %549 : vector<8x8xi32>
    %c3 = arith.constant 3 : index
    %551 = memref.load %arg2[%c3] : memref<128xf32, #tpu.memory_space<smem>>
    %552 = vector.broadcast %551 : f32 to vector<8x8xf32>
    %553 = arith.select %550, %552, %548 : vector<8x8xi1>, vector<8x8xf32>
    %c1_i32_112 = arith.constant 1 : i32
    %554 = vector.broadcast %c1_i32_112 : i32 to vector<8x8xi32>
    %555 = arith.cmpi eq, %5, %554 : vector<8x8xi32>
    %c7 = arith.constant 7 : index
    %556 = memref.load %arg2[%c7] : memref<128xf32, #tpu.memory_space<smem>>
    %557 = vector.broadcast %556 : f32 to vector<8x8xf32>
    %558 = arith.select %555, %557, %553 : vector<8x8xi1>, vector<8x8xf32>
    %c2_i32_113 = arith.constant 2 : i32
    %559 = vector.broadcast %c2_i32_113 : i32 to vector<8x8xi32>
    %560 = arith.cmpi eq, %5, %559 : vector<8x8xi32>
    %c11 = arith.constant 11 : index
    %561 = memref.load %arg2[%c11] : memref<128xf32, #tpu.memory_space<smem>>
    %562 = vector.broadcast %561 : f32 to vector<8x8xf32>
    %563 = arith.select %560, %562, %558 : vector<8x8xi1>, vector<8x8xf32>
    %c3_i32_114 = arith.constant 3 : i32
    %564 = vector.broadcast %c3_i32_114 : i32 to vector<8x8xi32>
    %565 = arith.cmpi eq, %5, %564 : vector<8x8xi32>
    %c15 = arith.constant 15 : index
    %566 = memref.load %arg2[%c15] : memref<128xf32, #tpu.memory_space<smem>>
    %567 = vector.broadcast %566 : f32 to vector<8x8xf32>
    %568 = arith.select %565, %567, %563 : vector<8x8xi1>, vector<8x8xf32>
    %c4_i32_115 = arith.constant 4 : i32
    %569 = vector.broadcast %c4_i32_115 : i32 to vector<8x8xi32>
    %570 = arith.cmpi eq, %5, %569 : vector<8x8xi32>
    %c19 = arith.constant 19 : index
    %571 = memref.load %arg2[%c19] : memref<128xf32, #tpu.memory_space<smem>>
    %572 = vector.broadcast %571 : f32 to vector<8x8xf32>
    %573 = arith.select %570, %572, %568 : vector<8x8xi1>, vector<8x8xf32>
    %c5_i32_116 = arith.constant 5 : i32
    %574 = vector.broadcast %c5_i32_116 : i32 to vector<8x8xi32>
    %575 = arith.cmpi eq, %5, %574 : vector<8x8xi32>
    %c23 = arith.constant 23 : index
    %576 = memref.load %arg2[%c23] : memref<128xf32, #tpu.memory_space<smem>>
    %577 = vector.broadcast %576 : f32 to vector<8x8xf32>
    %578 = arith.select %575, %577, %573 : vector<8x8xi1>, vector<8x8xf32>
    %c6_i32_117 = arith.constant 6 : i32
    %579 = vector.broadcast %c6_i32_117 : i32 to vector<8x8xi32>
    %580 = arith.cmpi eq, %5, %579 : vector<8x8xi32>
    %c27 = arith.constant 27 : index
    %581 = memref.load %arg2[%c27] : memref<128xf32, #tpu.memory_space<smem>>
    %582 = vector.broadcast %581 : f32 to vector<8x8xf32>
    %583 = arith.select %580, %582, %578 : vector<8x8xi1>, vector<8x8xf32>
    %c7_i32_118 = arith.constant 7 : i32
    %584 = vector.broadcast %c7_i32_118 : i32 to vector<8x8xi32>
    %585 = arith.cmpi eq, %5, %584 : vector<8x8xi32>
    %c31 = arith.constant 31 : index
    %586 = memref.load %arg2[%c31] : memref<128xf32, #tpu.memory_space<smem>>
    %587 = vector.broadcast %586 : f32 to vector<8x8xf32>
    %588 = arith.select %585, %587, %583 : vector<8x8xi1>, vector<8x8xf32>
    %c8_i32_119 = arith.constant 8 : i32
    %589 = vector.broadcast %c8_i32_119 : i32 to vector<8x8xi32>
    %590 = arith.cmpi eq, %5, %589 : vector<8x8xi32>
    %c35 = arith.constant 35 : index
    %591 = memref.load %arg2[%c35] : memref<128xf32, #tpu.memory_space<smem>>
    %592 = vector.broadcast %591 : f32 to vector<8x8xf32>
    %593 = arith.select %590, %592, %588 : vector<8x8xi1>, vector<8x8xf32>
    %c9_i32_120 = arith.constant 9 : i32
    %594 = vector.broadcast %c9_i32_120 : i32 to vector<8x8xi32>
    %595 = arith.cmpi eq, %5, %594 : vector<8x8xi32>
    %c39 = arith.constant 39 : index
    %596 = memref.load %arg2[%c39] : memref<128xf32, #tpu.memory_space<smem>>
    %597 = vector.broadcast %596 : f32 to vector<8x8xf32>
    %598 = arith.select %595, %597, %593 : vector<8x8xi1>, vector<8x8xf32>
    %c10_i32_121 = arith.constant 10 : i32
    %599 = vector.broadcast %c10_i32_121 : i32 to vector<8x8xi32>
    %600 = arith.cmpi eq, %5, %599 : vector<8x8xi32>
    %c43 = arith.constant 43 : index
    %601 = memref.load %arg2[%c43] : memref<128xf32, #tpu.memory_space<smem>>
    %602 = vector.broadcast %601 : f32 to vector<8x8xf32>
    %603 = arith.select %600, %602, %598 : vector<8x8xi1>, vector<8x8xf32>
    %c11_i32_122 = arith.constant 11 : i32
    %604 = vector.broadcast %c11_i32_122 : i32 to vector<8x8xi32>
    %605 = arith.cmpi eq, %5, %604 : vector<8x8xi32>
    %c47 = arith.constant 47 : index
    %606 = memref.load %arg2[%c47] : memref<128xf32, #tpu.memory_space<smem>>
    %607 = vector.broadcast %606 : f32 to vector<8x8xf32>
    %608 = arith.select %605, %607, %603 : vector<8x8xi1>, vector<8x8xf32>
    %c12_i32_123 = arith.constant 12 : i32
    %609 = vector.broadcast %c12_i32_123 : i32 to vector<8x8xi32>
    %610 = arith.cmpi eq, %5, %609 : vector<8x8xi32>
    %c51 = arith.constant 51 : index
    %611 = memref.load %arg2[%c51] : memref<128xf32, #tpu.memory_space<smem>>
    %612 = vector.broadcast %611 : f32 to vector<8x8xf32>
    %613 = arith.select %610, %612, %608 : vector<8x8xi1>, vector<8x8xf32>
    %c13_i32_124 = arith.constant 13 : i32
    %614 = vector.broadcast %c13_i32_124 : i32 to vector<8x8xi32>
    %615 = arith.cmpi eq, %5, %614 : vector<8x8xi32>
    %c55 = arith.constant 55 : index
    %616 = memref.load %arg2[%c55] : memref<128xf32, #tpu.memory_space<smem>>
    %617 = vector.broadcast %616 : f32 to vector<8x8xf32>
    %618 = arith.select %615, %617, %613 : vector<8x8xi1>, vector<8x8xf32>
    %c14_i32_125 = arith.constant 14 : i32
    %619 = vector.broadcast %c14_i32_125 : i32 to vector<8x8xi32>
    %620 = arith.cmpi eq, %5, %619 : vector<8x8xi32>
    %c59 = arith.constant 59 : index
    %621 = memref.load %arg2[%c59] : memref<128xf32, #tpu.memory_space<smem>>
    %622 = vector.broadcast %621 : f32 to vector<8x8xf32>
    %623 = arith.select %620, %622, %618 : vector<8x8xi1>, vector<8x8xf32>
    %c15_i32_126 = arith.constant 15 : i32
    %624 = vector.broadcast %c15_i32_126 : i32 to vector<8x8xi32>
    %625 = arith.cmpi eq, %5, %624 : vector<8x8xi32>
    %c63 = arith.constant 63 : index
    %626 = memref.load %arg2[%c63] : memref<128xf32, #tpu.memory_space<smem>>
    %627 = vector.broadcast %626 : f32 to vector<8x8xf32>
    %628 = arith.select %625, %627, %623 : vector<8x8xi1>, vector<8x8xf32>
    %c16_i32_127 = arith.constant 16 : i32
    %629 = vector.broadcast %c16_i32_127 : i32 to vector<8x8xi32>
    %630 = arith.cmpi eq, %5, %629 : vector<8x8xi32>
    %c67 = arith.constant 67 : index
    %631 = memref.load %arg2[%c67] : memref<128xf32, #tpu.memory_space<smem>>
    %632 = vector.broadcast %631 : f32 to vector<8x8xf32>
    %633 = arith.select %630, %632, %628 : vector<8x8xi1>, vector<8x8xf32>
    %c17_i32_128 = arith.constant 17 : i32
    %634 = vector.broadcast %c17_i32_128 : i32 to vector<8x8xi32>
    %635 = arith.cmpi eq, %5, %634 : vector<8x8xi32>
    %c71 = arith.constant 71 : index
    %636 = memref.load %arg2[%c71] : memref<128xf32, #tpu.memory_space<smem>>
    %637 = vector.broadcast %636 : f32 to vector<8x8xf32>
    %638 = arith.select %635, %637, %633 : vector<8x8xi1>, vector<8x8xf32>
    %c18_i32_129 = arith.constant 18 : i32
    %639 = vector.broadcast %c18_i32_129 : i32 to vector<8x8xi32>
    %640 = arith.cmpi eq, %5, %639 : vector<8x8xi32>
    %c75 = arith.constant 75 : index
    %641 = memref.load %arg2[%c75] : memref<128xf32, #tpu.memory_space<smem>>
    %642 = vector.broadcast %641 : f32 to vector<8x8xf32>
    %643 = arith.select %640, %642, %638 : vector<8x8xi1>, vector<8x8xf32>
    %c19_i32_130 = arith.constant 19 : i32
    %644 = vector.broadcast %c19_i32_130 : i32 to vector<8x8xi32>
    %645 = arith.cmpi eq, %5, %644 : vector<8x8xi32>
    %c79 = arith.constant 79 : index
    %646 = memref.load %arg2[%c79] : memref<128xf32, #tpu.memory_space<smem>>
    %647 = vector.broadcast %646 : f32 to vector<8x8xf32>
    %648 = arith.select %645, %647, %643 : vector<8x8xi1>, vector<8x8xf32>
    %c20_i32_131 = arith.constant 20 : i32
    %649 = vector.broadcast %c20_i32_131 : i32 to vector<8x8xi32>
    %650 = arith.cmpi eq, %5, %649 : vector<8x8xi32>
    %c83 = arith.constant 83 : index
    %651 = memref.load %arg2[%c83] : memref<128xf32, #tpu.memory_space<smem>>
    %652 = vector.broadcast %651 : f32 to vector<8x8xf32>
    %653 = arith.select %650, %652, %648 : vector<8x8xi1>, vector<8x8xf32>
    %c21_i32_132 = arith.constant 21 : i32
    %654 = vector.broadcast %c21_i32_132 : i32 to vector<8x8xi32>
    %655 = arith.cmpi eq, %5, %654 : vector<8x8xi32>
    %c87 = arith.constant 87 : index
    %656 = memref.load %arg2[%c87] : memref<128xf32, #tpu.memory_space<smem>>
    %657 = vector.broadcast %656 : f32 to vector<8x8xf32>
    %658 = arith.select %655, %657, %653 : vector<8x8xi1>, vector<8x8xf32>
    %c22_i32_133 = arith.constant 22 : i32
    %659 = vector.broadcast %c22_i32_133 : i32 to vector<8x8xi32>
    %660 = arith.cmpi eq, %5, %659 : vector<8x8xi32>
    %c91 = arith.constant 91 : index
    %661 = memref.load %arg2[%c91] : memref<128xf32, #tpu.memory_space<smem>>
    %662 = vector.broadcast %661 : f32 to vector<8x8xf32>
    %663 = arith.select %660, %662, %658 : vector<8x8xi1>, vector<8x8xf32>
    %c23_i32_134 = arith.constant 23 : i32
    %664 = vector.broadcast %c23_i32_134 : i32 to vector<8x8xi32>
    %665 = arith.cmpi eq, %5, %664 : vector<8x8xi32>
    %c95 = arith.constant 95 : index
    %666 = memref.load %arg2[%c95] : memref<128xf32, #tpu.memory_space<smem>>
    %667 = vector.broadcast %666 : f32 to vector<8x8xf32>
    %668 = arith.select %665, %667, %663 : vector<8x8xi1>, vector<8x8xf32>
    %c24_i32_135 = arith.constant 24 : i32
    %669 = vector.broadcast %c24_i32_135 : i32 to vector<8x8xi32>
    %670 = arith.cmpi eq, %5, %669 : vector<8x8xi32>
    %c99 = arith.constant 99 : index
    %671 = memref.load %arg2[%c99] : memref<128xf32, #tpu.memory_space<smem>>
    %672 = vector.broadcast %671 : f32 to vector<8x8xf32>
    %673 = arith.select %670, %672, %668 : vector<8x8xi1>, vector<8x8xf32>
    %c25_i32_136 = arith.constant 25 : i32
    %674 = vector.broadcast %c25_i32_136 : i32 to vector<8x8xi32>
    %675 = arith.cmpi eq, %5, %674 : vector<8x8xi32>
    %c103 = arith.constant 103 : index
    %676 = memref.load %arg2[%c103] : memref<128xf32, #tpu.memory_space<smem>>
    %677 = vector.broadcast %676 : f32 to vector<8x8xf32>
    %678 = arith.select %675, %677, %673 : vector<8x8xi1>, vector<8x8xf32>
    %c26_i32_137 = arith.constant 26 : i32
    %679 = vector.broadcast %c26_i32_137 : i32 to vector<8x8xi32>
    %680 = arith.cmpi eq, %5, %679 : vector<8x8xi32>
    %c107 = arith.constant 107 : index
    %681 = memref.load %arg2[%c107] : memref<128xf32, #tpu.memory_space<smem>>
    %682 = vector.broadcast %681 : f32 to vector<8x8xf32>
    %683 = arith.select %680, %682, %678 : vector<8x8xi1>, vector<8x8xf32>
    %c27_i32_138 = arith.constant 27 : i32
    %684 = vector.broadcast %c27_i32_138 : i32 to vector<8x8xi32>
    %685 = arith.cmpi eq, %5, %684 : vector<8x8xi32>
    %c111 = arith.constant 111 : index
    %686 = memref.load %arg2[%c111] : memref<128xf32, #tpu.memory_space<smem>>
    %687 = vector.broadcast %686 : f32 to vector<8x8xf32>
    %688 = arith.select %685, %687, %683 : vector<8x8xi1>, vector<8x8xf32>
    %c28_i32_139 = arith.constant 28 : i32
    %689 = vector.broadcast %c28_i32_139 : i32 to vector<8x8xi32>
    %690 = arith.cmpi eq, %5, %689 : vector<8x8xi32>
    %c115 = arith.constant 115 : index
    %691 = memref.load %arg2[%c115] : memref<128xf32, #tpu.memory_space<smem>>
    %692 = vector.broadcast %691 : f32 to vector<8x8xf32>
    %693 = arith.select %690, %692, %688 : vector<8x8xi1>, vector<8x8xf32>
    %c29_i32_140 = arith.constant 29 : i32
    %694 = vector.broadcast %c29_i32_140 : i32 to vector<8x8xi32>
    %695 = arith.cmpi eq, %5, %694 : vector<8x8xi32>
    %c119 = arith.constant 119 : index
    %696 = memref.load %arg2[%c119] : memref<128xf32, #tpu.memory_space<smem>>
    %697 = vector.broadcast %696 : f32 to vector<8x8xf32>
    %698 = arith.select %695, %697, %693 : vector<8x8xi1>, vector<8x8xf32>
    %c30_i32_141 = arith.constant 30 : i32
    %699 = vector.broadcast %c30_i32_141 : i32 to vector<8x8xi32>
    %700 = arith.cmpi eq, %5, %699 : vector<8x8xi32>
    %c123 = arith.constant 123 : index
    %701 = memref.load %arg2[%c123] : memref<128xf32, #tpu.memory_space<smem>>
    %702 = vector.broadcast %701 : f32 to vector<8x8xf32>
    %703 = arith.select %700, %702, %698 : vector<8x8xi1>, vector<8x8xf32>
    %c31_i32_142 = arith.constant 31 : i32
    %704 = vector.broadcast %c31_i32_142 : i32 to vector<8x8xi32>
    %705 = arith.cmpi eq, %5, %704 : vector<8x8xi32>
    %c127 = arith.constant 127 : index
    %706 = memref.load %arg2[%c127] : memref<128xf32, #tpu.memory_space<smem>>
    %707 = vector.broadcast %706 : f32 to vector<8x8xf32>
    %708 = arith.select %705, %707, %703 : vector<8x8xi1>, vector<8x8xf32>
    %709 = arith.addf %547, %708 : vector<8x8xf32>
    %cst_143 = arith.constant dense<0xFF800000> : vector<8xf32>
    %710 = vector.multi_reduction <maximumf>, %709, %cst_143 [1] : vector<8x8xf32> to vector<8xf32>
    %711 = vector.shape_cast %710 : vector<8xf32> to vector<8x1xf32>
    %712 = vector.broadcast %711 : vector<8x1xf32> to vector<8x8xf32>
    %713 = arith.subf %709, %712 : vector<8x8xf32>
    %714 = math.exp %713 : vector<8x8xf32>
    %cst_144 = arith.constant dense<0.000000e+00> : vector<8xf32>
    %715 = vector.multi_reduction <add>, %714, %cst_144 [1] : vector<8x8xf32> to vector<8xf32>
    %716 = vector.shape_cast %715 : vector<8xf32> to vector<8x1xf32>
    %717 = vector.broadcast %716 : vector<8x1xf32> to vector<8x8xf32>
    %718 = arith.divf %714, %717 : vector<8x8xf32>
    %719 = arith.truncf %718 : vector<8x8xf32> to vector<8x8xbf16>
    %cst_145 = arith.constant dense<0.000000e+00> : vector<8x8xf32>
    %720 = tpu.matmul %719, %546, %cst_145 {dimension_numbers = #tpu.dot_dimension_numbers<[1], [0], [0], [1], [0, 0, 1, 1], [], []>} : vector<8x8xbf16>, vector<8x8xbf16>, vector<8x8xf32> -> vector<8x8xf32>
    %c0_146 = arith.constant 0 : index
    %c24_147 = arith.constant 24 : index
    %721 = vector.load %arg9[%c0_146, %c24_147] : memref<8x32xf32, #tpu.memory_space<vmem>>, vector<8x8xf32>
    tpu.vector_store %arg9[%c0_146, %c24_147], %720 {strides = array<i32>} : memref<8x32xf32, #tpu.memory_space<vmem>>, vector<8x8xf32>,
    %c0_148 = arith.constant 0 : index
    %c0_149 = arith.constant 0 : index
    %722 = vector.load %arg9[%c0_148, %c0_149] : memref<8x32xf32, #tpu.memory_space<vmem>>, vector<8x32xf32>
    %723 = arith.truncf %722 : vector<8x32xf32> to vector<8x32xbf16>
    %c0_150 = arith.constant 0 : index
    %c0_151 = arith.constant 0 : index
    %724 = vector.load %arg5[%c0_150, %c0_151] : memref<32x32xbf16, #tpu.memory_space<vmem>>, vector<32x32xbf16>
    %cst_152 = arith.constant dense<0.000000e+00> : vector<8x32xf32>
    %725 = tpu.matmul %723, %724, %cst_152 {dimension_numbers = #tpu.dot_dimension_numbers<[1], [0], [0], [1], [0, 0, 1, 1], [], []>} : vector<8x32xbf16>, vector<32x32xbf16>, vector<8x32xf32> -> vector<8x32xf32>
    %c0_153 = arith.constant 0 : index
    %c0_154 = arith.constant 0 : index
    %c0_155 = arith.constant 0 : index
    %726 = vector.load %arg7[%c0_153, %c0_154, %c0_155] : memref<1x8x32xf32, #tpu.memory_space<vmem>>, vector<1x8x32xf32>
    %727 = vector.shape_cast %726 : vector<1x8x32xf32> to vector<8x32xf32>
    %728 = vector.shape_cast %725 : vector<8x32xf32> to vector<1x8x32xf32>
    tpu.vector_store %arg7[%c0_153, %c0_154, %c0_155], %728 {strides = array<i32>} : memref<1x8x32xf32, #tpu.memory_space<vmem>>, vector<1x8x32xf32>,
    return
  }
  func.func @transform_0(%arg0: i32, %arg1: i32) -> i32 {
    %c0_i32 = arith.constant 0 : i32
    %c0_i32_0 = arith.constant 0 : i32
    return %c0_i32 : i32
  }
  func.func @transform_1(%arg0: i32, %arg1: i32) -> (i32, i32, i32) {
    %c0_i32 = arith.constant 0 : i32
    %c0_i32_0 = arith.constant 0 : i32
    %c0_i32_1 = arith.constant 0 : i32
    return %arg0, %c0_i32, %c0_i32_0 : i32, i32, i32
  }
  func.func @transform_2(%arg0: i32, %arg1: i32) -> (i32, i32) {
    %c0_i32 = arith.constant 0 : i32
    %c0_i32_0 = arith.constant 0 : i32
    %c0_i32_1 = arith.constant 0 : i32
    return %c0_i32, %c0_i32_0 : i32, i32
  }
  func.func @transform_3(%arg0: i32, %arg1: i32) -> (i32, i32) {
    %c0_i32 = arith.constant 0 : i32
    %c0_i32_0 = arith.constant 0 : i32
    %c0_i32_1 = arith.constant 0 : i32
    return %c0_i32, %c0_i32_0 : i32, i32
  }
  func.func @transform_4(%arg0: i32, %arg1: i32) -> (i32, i32) {
    %c0_i32 = arith.constant 0 : i32
    %c0_i32_0 = arith.constant 0 : i32
    return %arg1, %c0_i32 : i32, i32
  }
  func.func @transform_5(%arg0: i32, %arg1: i32) -> (i32, i32, i32) {
    %c0_i32 = arith.constant 0 : i32
    %c0_i32_0 = arith.constant 0 : i32
    return %arg0, %arg1, %c0_i32 : i32, i32, i32
  }
}

</mosaic_0001>

<bundles_post_ra>
// kernel: tpu_custom_call.1
= control target key start
LH: loop header
LB: loop body
LE: loop exit
PB: predicated region body
PF: predicated region fallthrough
CT: control target
= control target key end

     0   :  { %10 = vsyncpa [#allocation7], 0  ;;  %s3179_s0 = inlined_call_operand.hbm [shape: f32[128], index: 0, kind: input, shape index: {}]   ;;  %s3180_s1 = inlined_call_operand.hbm [shape: bf16[2,8,32], index: 1, kind: input, shape index: {}]   ;;  %s3181_s2 = inlined_call_operand.hbm [shape: bf16[32,96], index: 2, kind: input, shape index: {}]   ;;  %s3182_s3 = inlined_call_operand.hbm [shape: bf16[32,32], index: 3, kind: input, shape index: {}]   ;;  %s3183_s4 = inlined_call_operand.hbm [shape: s32[8,8], index: 4, kind: input, shape index: {}]   ;;  %s3184_s5 = inlined_call_operand.hbm [shape: f32[2,8,32], index: 5, kind: output, shape index: {}]  }
   0x1   :  { %11 = vsyncpa [#allocation5], 0 }
   0x2   :  { %13 = vsyncpa [#allocation5 + $0x1], 0 }
   0x3   :  { %14 = vsyncpa [#allocation10], 0 }
   0x4   :  { %15 = vsyncpa [#allocation13], 0 }
   0x5   :  { %16 = vsyncpa [#allocation6], 0 }
   0x6   :  { %18 = vsyncpa [#allocation6 + $0x1], 0  ;;  %s2178_s18 = smov 0   ;;  %s2180_s19 = smov 0  }
   0x7   :  { %s2182_s20 = smov 0   ;;  %s2184_s21 = smov 0  }
   0x8   :  { %s2186_s22 = smov 0   ;;  %s2188_s23 = smov 0  }
   0x9 LB: > { %s2124_s24 = smov [#allocation9]   ;;  %s1496_s26 = sadd.s32 4294967295, %s2122_s23   ;;  %s2122_s23 = sphi %s2188_s23, %s24_s23   ;;  %s2118_s22 = sphi %s2186_s22, %s3208_s22   ;;  %s2114_s21 = sphi %s2184_s21, %s3207_s21   ;;  %s2110_s20 = sphi %s2182_s20, %s3206_s20   ;;  %s2106_s19 = sphi %s2180_s19, %s3205_s19   ;;  %s2102_s18 = sphi %s2178_s18, %s3204_s18  }
   0xa   : > { %s205_s25 = sshll.u32 %s2124_s24, 4  ;;  %p1498_p0 = scmp.ge.s32.totalorder %s2122_s23, 1  ;;  %s2217_s25 = int_to_ptr.vmem [resolvable:$true] %s205_s25 }
   0xb   : > { %p2212_p1 = scmp.eq.s32.totalorder %s1496_s26, 0  ;;  %p184_p2 = scmp.lt.s32.totalorder %s2122_s23, 3 }
   0xc   : > { %s2125_s30 = smov [#allocation11]   ;;  %s1901_s9 = scalar_lea.hbm %s3181_s2, 256 }
   0xd   : > { %s3189_s27 = scalar_select %p2212_p1, 1, 0 }
   0xe   : > { %p2219_p3 = pnand %p1498_p0, %p184_p2  ;;  %s218_s6 = sshll.u32 %s2125_s30, 4  ;;  %s2232_s6 = int_to_ptr.vmem [resolvable:$true] %s218_s6 }
   0xf   : > { %p1902_p7 = scmp.ne.s32.totalorder %s3181_s2, %s1901_s9  ;;  %p1908_p11 = scmp.lt.u32.totalorder %s1901_s9, %s3181_s2 }
  0x10   : > { %s3190_s28 = scalar_select %p2219_p3, 1, 0 }
  0x11   : > { %p1771_p5 = pneg %p2219_p3 }
  0x13   : > { %p2228_p6 = pnand %p1771_p5, %p2212_p1 }
  0x15   : > { %p2242_p8 = pneg %p2228_p6 }
  0x17   : > { %p1904_p9 = pnand %p2242_p8, %p1902_p7 }
  0x19   : > { %p1905_p10 = pneg %p1904_p9 }
  0x1b   : > { %p1910_p12 = pnand %p1908_p11, %p1905_p10 }
  0x1d   : > { %1913 = shalt.err (!%p1910_p12)
}
  0x1e   : > { %s1914_s15 = scalar_lea.vmem %s2217_s25, 256  ;;  %p1922_p5 = scmp.lt.s32.totalorder %s2217_s25, %s2217_s25 }
  0x1f   : > { %p1915_p13 = scmp.ne.s32.totalorder %s2217_s25, %s1914_s15  ;;  %p1923_p4 = scmp.lt.s32.totalorder %s1914_s15, %s1914_s15 }
  0x21   : > { %p1917_p0 = pnand %p1915_p13, %p2242_p8  ;;  %p1924_p7 = por %p1923_p4, %p1922_p5 }
  0x23   : > { %p1918_p2 = pneg %p1917_p0 }
  0x25   : > { %p1925_p9 = pnand %p1924_p7, %p1918_p2 }
  0x27   : > { %1928 = shalt.err (!%p1925_p9)
}
  0x28   : > { %s2126_s16 = smov 64   ;;  %s2127_s17 = smov 4  }
  0x29   : > { %1777 = dma.hbm_to_vmem [thread:$0]  (!%p2228_p6), %s3181_s2, 256, %s2217_s25, [#allocation10], %s2126_s16, %s2126_s16, %s2127_s17  }
  0x2a   : > { %s1929_s9 = scalar_lea.hbm %s3179_s0, 16 }
  0x2b   : > { %p1930_p4 = scmp.ne.s32.totalorder %s3179_s0, %s1929_s9  ;;  %p1936_p12 = scmp.lt.u32.totalorder %s1929_s9, %s3179_s0 }
  0x2d   : > { %p1932_p10 = pnand %p1930_p4, %p2242_p8 }
  0x2f   : > { %p1933_p11 = pneg %p1932_p10 }
  0x31   : > { %p1938_p13 = pnand %p1936_p12, %p1933_p11 }
  0x33   : > { %1941 = shalt.err (!%p1938_p13)
}
  0x34   : > { %s2128_s15 = smov [#allocation4]   ;;  %s1942_s8 = scalar_lea.hbm %s3182_s3, 256 }
  0x35   : > { %1774 = dma.hbm_to_smem (!%p2228_p6), %s3179_s0, 16, %s2128_s15, [#allocation7]  }
  0x36   : > { %p1943_p0 = scmp.ne.s32.totalorder %s3182_s3, %s1942_s8  ;;  %p1949_p7 = scmp.lt.u32.totalorder %s1942_s8, %s3182_s3 }
  0x38   : > { %p1945_p2 = pnand %p1943_p0, %p2242_p8 }
  0x3a   : > { %p1946_p5 = pneg %p1945_p2 }
  0x3c   : > { %p1951_p9 = pnand %p1949_p7, %p1946_p5 }
  0x3e   : > { %1954 = shalt.err (!%p1951_p9)
}
  0x3f   : > { %s1955_s14 = scalar_lea.vmem %s2232_s6, 256  ;;  %p1963_p12 = scmp.lt.s32.totalorder %s2232_s6, %s2232_s6 }
  0x40   : > { %p1956_p4 = scmp.ne.s32.totalorder %s2232_s6, %s1955_s14  ;;  %p1964_p13 = scmp.lt.s32.totalorder %s1955_s14, %s1955_s14 }
  0x42   : > { %p1958_p10 = pnand %p1956_p4, %p2242_p8  ;;  %p1965_p0 = por %p1964_p13, %p1963_p12 }
  0x44   : > { %p1959_p11 = pneg %p1958_p10 }
  0x46   : > { %p1966_p2 = pnand %p1965_p0, %p1959_p11 }
  0x48   : > { %1969 = shalt.err (!%p1966_p2)
}
  0x49   : > { %1780 = dma.hbm_to_vmem [thread:$0]  (!%p2228_p6), %s3182_s3, 256, %s2232_s6, [#allocation10], %s2126_s16, %s2126_s16, %s2127_s17  }
  0x4a   : > { %s2129_s24 = smov [#allocation12]   ;;  %s1970_s10 = scalar_lea.hbm %s3183_s4, 128 }
  0x4b   : > { %s234_s30 = sshll.u32 %s2129_s24, 4  ;;  %p1971_p5 = scmp.ne.s32.totalorder %s3183_s4, %s1970_s10  ;;  %s235_s30 = int_to_ptr.vmem [resolvable:$true] %s234_s30 }
  0x4c   : > { %p1977_p4 = scmp.lt.u32.totalorder %s1970_s10, %s3183_s4 }
  0x4d   : > { %p1973_p7 = pnand %p1971_p5, %p2242_p8 }
  0x4f   : > { %p1974_p9 = pneg %p1973_p7 }
  0x51   : > { %p1979_p10 = pnand %p1977_p4, %p1974_p9 }
  0x53   : > { %1982 = shalt.err (!%p1979_p10)
}
  0x54   : > { %s1983_s6 = scalar_lea.vmem %s235_s30, 128  ;;  %p1991_p0 = scmp.lt.s32.totalorder %s235_s30, %s235_s30 }
  0x55   : > { %p1984_p11 = scmp.ne.s32.totalorder %s235_s30, %s1983_s6  ;;  %p1992_p2 = scmp.lt.s32.totalorder %s1983_s6, %s1983_s6 }
  0x57   : > { %p1986_p12 = pnand %p1984_p11, %p2242_p8  ;;  %p1993_p3 = por %p1992_p2, %p1991_p0 }
  0x59   : > { %p1987_p13 = pneg %p1986_p12 }
  0x5b   : > { %p1994_p1 = pnand %p1993_p3, %p1987_p13 }
  0x5d   : > { %1997 = shalt.err (!%p1994_p1)
}
  0x5e   : > { %1783 = dma.hbm_to_vmem [thread:$0]  (!%p2228_p6), %s3183_s4, 128, %s235_s30, [#allocation13]  }
  0x5f   : > { %s1497_s12 = sadd.s32 4294967294, %s2122_s23   ;;  %s36_s15 = sadd.s32 1, %s2118_s22 }
  0x60   : > { %p38_p1 = scmp.ge.s32.totalorder %s36_s15, 2  ;;  %s64_s29 = sadd.s32 1, %s2110_s20 }
  0x61   : > { %p71_p3 = scmp.ne.s32.totalorder %s2110_s20, %s2106_s19  ;;  %p72_p8 = scmp.eq.s32.totalorder %s2122_s23, 0 }
  0x62   : > { %s3210_s15 = smov (%p38_p1, %s36_s15), 0  ;;  %p77_p7 = scmp.ne.s32.totalorder %s2106_s19, %s2102_s18 }
  0x63   : > { %p2334_p5 = por %p72_p8, %p71_p3  ;;  %s61_s24 = ssub.s32 %s2118_s22, %s3210_s15 }
  0x64   : > { %p171_p6 = scmp.eq.s32.totalorder %s1496_s26, 1  ;;  %p62_p9 = scmp.eq.s32.totalorder %s61_s24, 0 }
  0x65   : > { %p3194_p4 = scmp.ne.s32.totalorder %s3189_s27, 0  ;;  %p177_p12 = scmp.eq.s32.totalorder %s1497_s12, 1 }
  0x66   : > { %p2350_p11 = por %p171_p6, %p71_p3  ;;  %p1796_p0 = scmp.lt.s32.totalorder %s2122_s23, 2 }
  0x67   : > { %p2346_p10 = por %p3194_p4, %p77_p7  ;;  %p2357_p13 = por %p177_p12, %p77_p7 }
  0x68   : > { %s3196_s7 = scalar_select %p2350_p11, 1, 0 }
  0x69   : > { %s2355_s8 = scalar_select %p62_p9, %s2110_s20, %s64_s29  }
  0x6a   : > { %s3197_s10 = scalar_select %p2357_p13, 1, 0 }
  0x6b   : > { %s245_s11 = sand.u32 1, %s2110_s20   ;;  %s1505_s26 = sshll.u32 %s2118_s22, 6 }
  0x6c   : > { %s1504_s9 = sshll.u32 %s245_s11, 2  ;;  %s2367_s6 = scalar_lea.hbm %s3180_s1, %s1505_s26 }
  0x6d   : > { %s249_s16 = scalar_lea.vmem [#allocation8], %s1504_s9  ;;  %p2371_p2 = pnand %p1796_p0, %p2334_p5 }
  0x6e   : > { %s256_s17 = sshll.u32 %s249_s16, 4  ;;  %s246_s29 = scalar_lea.sflag [#allocation5], %s245_s11  ;;  %s2375_s17 = int_to_ptr.vmem [resolvable:$true] %s256_s17 }
  0x6f   : > { %s1998_s24 = scalar_lea.hbm %s2367_s6, 64  ;;  %p2000_p3 = pneg %p2371_p2 }
  0x70   : > { %p1999_p1 = scmp.ne.s32.totalorder %s2367_s6, %s1998_s24  ;;  %s2003_s25 = scalar_lea.hbm %s3180_s1, 128 }
  0x71   : > { %p2004_p5 = scmp.lt.u32.totalorder %s2367_s6, %s3180_s1  ;;  %p2005_p6 = scmp.lt.u32.totalorder %s2003_s25, %s1998_s24 }
  0x72   : > { %p2001_p8 = pnand %p2000_p3, %p1999_p1  ;;  %p2007_p4 = scmp.lt.u32.totalorder %s1998_s24, %s2367_s6 }
  0x73   : > { %p2006_p9 = por %p2005_p6, %p2004_p5 }
  0x74   : > { %p2002_p7 = pneg %p2001_p8 }
  0x75   : > { %p2008_p12 = por %p2007_p4, %p2006_p9 }
  0x77   : > { %p2009_p0 = pnand %p2008_p12, %p2002_p7 }
  0x79   : > { %2012 = shalt.err (!%p2009_p0)
}
  0x7a   : > { %s2013_s11 = scalar_lea.vmem %s2375_s17, 64  ;;  %s2130_s16 = smov [#allocation8]  }
  0x7b   : > { %p2014_p1 = scmp.ne.s32.totalorder %s2375_s17, %s2013_s11  ;;  %s2018_s26 = sshll.u32 %s2130_s16, 4  ;;  %s2019_s26 = int_to_ptr.vmem [resolvable:$false] %s2018_s26 }
  0x7c   : > { %s2020_s9 = scalar_lea.vmem %s2019_s26, 128  ;;  %p2021_p11 = scmp.lt.s32.totalorder %s2375_s17, %s2019_s26 }
  0x7d   : > { %p2016_p8 = pnand %p2014_p1, %p2000_p3  ;;  %p2022_p5 = scmp.lt.s32.totalorder %s2020_s9, %s2013_s11 }
  0x7f   : > { %p2017_p13 = pneg %p2016_p8  ;;  %p2023_p6 = por %p2022_p5, %p2021_p11 }
  0x81   : > { %p2024_p9 = pnand %p2023_p6, %p2017_p13 }
  0x83   : > { %2027 = shalt.err (!%p2024_p9)
}
  0x84   : > { %1787 = dma.hbm_to_vmem [thread:$0]  (!%p2371_p2), %s2367_s6, 64, %s2375_s17, %s246_s29  }
  0x85   : > { %p3199_p7 = scmp.ne.s32.totalorder %s3190_s28, 0 }
  0x86   : > { %p3200_p3 = scmp.ne.s32.totalorder (!%p3199_p7), %s3189_s27, 0 }
  0x87   : > { %265 = sbr.rel (%p3199_p7) target bundleno = 1664 (0x680), region = 40 }
  0x8e   : > { %2081 = dma.done.wait (%p3200_p3), [#allocation7], 16  }
  0x8f   : > { %2083 = vsyncadd (%p3200_p3), [#allocation7], 4294967280  ;;  %s2409_s24 = sand.u32 1, %s2106_s19  }
  0x90   : > { %s1508_s25 = sshll.u32 %s2409_s24, 2  ;;  %s272_s12 = scalar_lea.sflag [#allocation5], %s2409_s24 }
  0x91   : > { %s275_s13 = scalar_lea.vmem [#allocation8], %s1508_s25 }
  0x92   : > { %2085 = dma.done.wait (%p2346_p10), %s272_s12, 64  }
  0x93   : > { %2087 = vsyncadd (%p2346_p10), %s272_s12, 4294967232 }
  0x94   : > { %2089 = dma.done.wait (%p3200_p3), [#allocation10], 512  }
  0x95   : > { %2091 = vsyncadd (%p3200_p3), [#allocation10], 4294966784 }
  0x96   : > { %2093 = dma.done.wait (%p3200_p3), [#allocation13], 128  }
  0x97   : > { %2095 = vsyncadd (%p3200_p3), [#allocation13], 4294967168 }
  0x98   : > { %292 = sfence }
  0x99   : > { %v1872_v0 = vld [vmem:[#allocation9] sm:$0xff]   ;;  %v2131_v1 = vmov 0.0   ;;  %v1873_v2 = vld [vmem:[#allocation9 + $0x8] sm:$0xff]   ;;  %vm2132_vm0 = vmmov 0   ;;  %v320_v3 = vld [vmem:[%s275_s13] sm:$0xf] }
  0x9a   : > { %1687 = vmatprep.subr.bf16.mxu0 %v2131_v1  ;;  %1695 = vmatprep.subr.bf16.mxu1 %v2131_v1  ;;  %vm337_vm1 = vcmask 261120   ;;  %vm382_vm2 = vcmask 781312   ;;  %s2133_s27 = smov 120   ;;  %s2134_s28 = smov 96   ;;  %vm525_vm3 = vcmask 64512   ;;  %v2462_v28 = vld [vmem:[#allocation12] sm:$0xff] }
  0x9b   : > { %1688 = vmatpush3.bf16.msra.mxu0 %v1872_v0  ;;  %1691 = vmatprep.mubr.msk.bf16.mxu0 %vm2132_vm0, %v2131_v1  ;;  %s2135_s30 = smov 80   ;;  %s2136_s6 = smov 88   ;;  %vm392_vm4 = vcmp.eq.s32.totalorder %v2462_v28, 0  ;;  %vm396_vm5 = vcmp.eq.s32.totalorder %v2462_v28, 1  ;;  %vm400_vm6 = vcmp.eq.s32.totalorder %v2462_v28, 2  ;;  %vm404_vm7 = vcmp.eq.s32.totalorder %v2462_v28, 3 }
  0x9c   : > { %1689 = vmatprep.subr.bf16.mxu0 %v2131_v1  ;;  %1697 = vmatprep.mubr.msk.bf16.mxu1 %vm2132_vm0, %v2131_v1  ;;  %s2137_s17 = smov 72   ;;  %s2138_s29 = smov 112   ;;  %vm408_vm8 = vcmp.eq.s32.totalorder %v2462_v28, 4  ;;  %vm412_vm9 = vcmp.eq.s32.totalorder %v2462_v28, 5  ;;  %vm416_vm10 = vcmp.eq.s32.totalorder %v2462_v28, 6  ;;  %vm420_vm11 = vcmp.eq.s32.totalorder %v2462_v28, 7 }
  0x9d   : > { %s2139_s14 = smov 104   ;;  %s393_s11 = sld [smem:[#allocation4]]  ;;  %vm424_vm12 = vcmp.eq.s32.totalorder %v2462_v28, 8  ;;  %vm428_vm13 = vcmp.eq.s32.totalorder %v2462_v28, 9  ;;  %vm432_vm14 = vcmp.eq.s32.totalorder %v2462_v28, 10  ;;  %vm436_vm15 = vcmp.eq.s32.totalorder %v2462_v28, 11 }
  0x9e   : > { %s1516_s16 = sld [smem:[#allocation4 + $0x4]]  ;;  %s1517_s26 = sld [smem:[#allocation4 + $0x8]] }
  0x9f   : > { %1690 = vmatpush3.bf16.msra.mxu0 %v1873_v2  ;;  %s1550_s9 = sld [smem:[#allocation4 + $0x1]]  ;;  %s1518_s25 = sld [smem:[#allocation4 + $0xc]] }
  0xa0   : > { %1701 = vmatprep.subr.bf16.mxu0 %v2131_v1  ;;  %s1551_s12 = sld [smem:[#allocation4 + $0x5]]  ;;  %s1519_s13 = sld [smem:[#allocation4 + $0x10]] }
  0xa1   : > { %p3201_p11 = scmp.ne.s32.totalorder %s3196_s7, 0 }
  0xa2   : > { %1692 = vmatmul.mubr.msk.bf16.vlgmr.msra.gmra.mrb[0].mxu0 %vm337_vm1, %v320_v3 }
  0xa3   : > { %1703 = vmatprep.mubr.msk.bf16.mxu0 %vm2132_vm0, %v2131_v1  ;;  %v394_v29 = vstv %s393_s11  ;;  %s2489_s11 = sld [smem:[#allocation4 + $0x1c]] }
  0xa4   : > { %v395_v30 = vsel %vm392_vm4, %v394_v29, 0.0  ;;  %v398_v31 = vstv %s1516_s16  ;;  %v402_v33 = vstv %s1517_s26  ;;  %s2493_s16 = sld [smem:[#allocation4 + $0xa]]  ;;  %s2498_s26 = sld [smem:[#allocation4 + $0x15]] }
  0xa5   : > { %v399_v32 = vsel %vm396_vm5, %v398_v31, %v395_v30  ;;  %v637_v34 = vstv %s1550_s9  ;;  %v406_v36 = vstv %s1518_s25  ;;  %s2500_s9 = sld [smem:[#allocation4 + $0x20]]  ;;  %s2503_s25 = sld [smem:[#allocation4 + $0x3]] }
  0xa6   : > { %v403_v35 = vsel %vm400_vm6, %v402_v33, %v399_v32  ;;  %v638_v37 = vsel %vm392_vm4, %v637_v34, 0.0  ;;  %v640_v38 = vstv %s1551_s12  ;;  %v410_v40 = vstv %s1519_s13  ;;  %s2508_s12 = sld [smem:[#allocation4 + $0xe]]  ;;  %s2514_s13 = sld [smem:[#allocation4 + $0x19]] }
  0xa7   : > { %v407_v39 = vsel %vm404_vm7, %v406_v36, %v403_v35  ;;  %v641_v41 = vsel %vm396_vm5, %v640_v38, %v638_v37 }
  0xa8   : > { %v411_v43 = vsel %vm408_vm8, %v410_v40, %v407_v39 }
  0xa9   : > { %v422_v55 = vstv %s2489_s11  ;;  %s2550_s11 = sld [smem:[#allocation4 + $0x21]] }
  0xaa   : > { %v863_v57 = vstv %s2493_s16  ;;  %v652_v59 = vstv %s2498_s26  ;;  %s2553_s16 = sld [smem:[#allocation4 + $0x2c]]  ;;  %s2558_s26 = sld [smem:[#allocation4 + $0xf]] }
  0xab   : > { %v426_v61 = vstv %s2500_s9  ;;  %v1077_v62 = vstv %s2503_s25  ;;  %s2564_s9 = sld [smem:[#allocation4 + $0x1a]]  ;;  %s2569_s25 = sld [smem:[#allocation4 + $0x25]] }
  0xac   : > { %v866_v0 = vstv %s2508_s12  ;;  %v655_v3 = vstv %s2514_s13  ;;  %s2574_s12 = sld [smem:[#allocation4 + $0x30]]  ;;  %s2579_s13 = sld [smem:[#allocation4 + $0x13]] }
  0xb1   : > { %v664_v30 = vstv %s2569_s25  ;;  %s2642_s25 = sld [smem:[#allocation4 + $0x1f]] }
  0xb2   : > { %v442_v32 = vstv %s2574_s12  ;;  %v1089_v34 = vstv %s2579_s13  ;;  %s2648_s12 = sld [smem:[#allocation4 + $0x2a]]  ;;  %s2653_s13 = sld [smem:[#allocation4 + $0x35]] }
 0x175   : > { %v375_v4 = vpop.f32.mrb[0].mxu0 }
 0x176   : > { %v381_v5 = vpack.c.bf16 %v375_v4, %v375_v4  ;;  %v1693_v6 = vpop.f32.mrb[1].mxu0 }
 0x177   : > { %v378_v7 = vpop.f32.mrb[2].mxu0  ;;  %v1078_v6 = vsel %vm392_vm4, %v1077_v62, 0.0  ;;  %v676_v62 = vstv %s2653_s13  ;;  %s2726_s13 = sld [smem:[#allocation4 + $0x2f]] }
 0x178   : > { %383 = vst.msk [vmem:[#allocation2] sm:$0xf] %vm382_vm2, %v381_v5  ;;  %v1694_v8 = vpop.f32.mrb[3].mxu0  ;;  %vm440_vm2 = vcmp.eq.s32.totalorder %v2462_v28, 12 }
 0x17f   : > { %v1874_v9 = vld [vmem:[#allocation2] ss:$0 sps:$4 sm:$0xff]  }
 0x180   : > { %v1875_v10 = vld [vmem:[#allocation2] ss:$0 sps:$4 sm:$0xff]   ;;  %735 = vrot.lane.b32.xlu1 %v1874_v9, %s2133_s27  ;;  %s1552_s27 = sld [smem:[#allocation4 + $0x9]] }
 0x181   : > { %523 = vrot.lane.b32.xlu0 %v1875_v10, %s2134_s28  ;;  %v1876_v11 = vld [vmem:[#allocation2] ss:$0 sps:$4 sm:$0xff]   ;;  %s1520_s28 = sld [smem:[#allocation4 + $0x14]] }
 0x182   : > { %v2436_v12 = vld [vmem:[#allocation2] ss:$0 sps:$4 sm:$0xff]  }
 0x183   : > { %v2439_v13 = vld [vmem:[#allocation2] ss:$0 sps:$4 sm:$0xff]  }
 0x184   : > { %960 = vrot.lane.b32.xlu1 %v1876_v11, %s2135_s30  ;;  %v1879_v14 = vld [vmem:[#allocation2] ss:$0 sps:$4 sm:$0xff]   ;;  %s2471_s30 = sld [smem:[#allocation4 + $0x2]] }
 0x185   : > { %740 = vrot.lane.b32.xlu0 %v2436_v12, %s2136_s6  ;;  %v1880_v15 = vld [vmem:[#allocation2] ss:$0 sps:$4 sm:$0xff]   ;;  %s2476_s6 = sld [smem:[#allocation4 + $0xd]] }
 0x186   : > { %v390_v20 = vld [vmem:[#allocation2] sm:$0xf]  ;;  %v643_v42 = vstv %s1552_s27  ;;  %s2516_s27 = sld [smem:[#allocation4 + $0x24]] }
 0x187   : > { %v414_v44 = vstv %s1520_s28  ;;  %v644_v46 = vsel %vm400_vm6, %v643_v42, %v641_v41  ;;  %s2521_s28 = sld [smem:[#allocation4 + $0x7]] }
 0x188   : > { %1180 = vrot.lane.b32.xlu1 %v2439_v13, %s2137_s17  ;;  %s2478_s17 = sld [smem:[#allocation4 + $0x18]]  ;;  %v415_v48 = vsel %vm412_vm9, %v414_v44, %v411_v43 }
 0x189   : > { %955 = vrot.lane.b32.xlu0 %v1879_v14, %s2138_s29  ;;  %s2482_s29 = sld [smem:[#allocation4 + $0x6]] }
 0x18a   : > { %v857_v45 = vstv %s2471_s30  ;;  %s2526_s30 = sld [smem:[#allocation4 + $0x12]] }
 0x18b   : > { %v646_v47 = vstv %s2476_s6  ;;  %v858_v50 = vsel %vm392_vm4, %v857_v45, 0.0  ;;  %s2532_s6 = sld [smem:[#allocation4 + $0x1d]]  ;;  %vm444_vm4 = vcmp.eq.s32.totalorder %v2462_v28, 13 }
 0x18c   : > { %v647_v52 = vsel %vm404_vm7, %v646_v47, %v644_v46  ;;  %v430_v5 = vstv %s2516_s27  ;;  %s2585_s27 = sld [smem:[#allocation4 + $0x1e]] }
 0x18d   : > { %1175 = vrot.lane.b32.xlu0 %v1880_v15, %s2139_s14  ;;  %s2487_s14 = sld [smem:[#allocation4 + $0x11]]  ;;  %v1080_v7 = vstv %s2521_s28 }
 0x18e   : > { %v418_v49 = vstv %s2478_s17  ;;  %s2534_s17 = sld [smem:[#allocation4 + $0x28]]  ;;  %s2590_s28 = sld [smem:[#allocation4 + $0x29]] }
 0x18f   : > { %v860_v51 = vstv %s2482_s29  ;;  %v419_v54 = vsel %vm416_vm10, %v418_v49, %v415_v48  ;;  %s2539_s29 = sld [smem:[#allocation4 + $0xb]] }
 0x190   : > { %v861_v56 = vsel %vm396_vm5, %v860_v51, %v858_v50  ;;  %v423_v60 = vsel %vm420_vm11, %v422_v55, %v419_v54  ;;  %v869_v9 = vstv %s2526_s30  ;;  %s2595_s30 = sld [smem:[#allocation4 + $0x34]] }
 0x191   : > { %v864_v63 = vsel %vm400_vm6, %v863_v57, %v861_v56  ;;  %v427_v4 = vsel %vm424_vm12, %v426_v61, %v423_v60  ;;  %v658_v11 = vstv %s2532_s6  ;;  %s2600_s6 = sld [smem:[#allocation4 + $0x17]]  ;;  %v887_v60 = vstv %s2648_s12  ;;  %s2721_s12 = sld [smem:[#allocation4 + $0x4c]] }
 0x192   : > { %v867_v8 = vsel %vm404_vm7, %v866_v0, %v864_v63  ;;  %v431_v14 = vsel %vm428_vm13, %v430_v5, %v427_v4  ;;  %v878_v36 = vstv %s2585_s27  ;;  %s2658_s27 = sld [smem:[#allocation4 + $0x40]] }
 0x193   : > { %v649_v53 = vstv %s2487_s14  ;;  %s2544_s14 = sld [smem:[#allocation4 + $0x16]] }
 0x194   : > { %v650_v58 = vsel %vm408_vm8, %v649_v53, %v647_v52  ;;  %v434_v15 = vstv %s2534_s17  ;;  %s2606_s17 = sld [smem:[#allocation4 + $0x22]]  ;;  %v667_v38 = vstv %s2590_s28  ;;  %s2663_s28 = sld [smem:[#allocation4 + $0x23]] }
 0x195   : > { %v653_v2 = vsel %vm412_vm9, %v652_v59, %v650_v58  ;;  %v1098_v58 = vstv %s2642_s25  ;;  %s2716_s25 = sld [smem:[#allocation4 + $0x41]] }
 0x196   : > { %v656_v10 = vsel %vm416_vm10, %v655_v3, %v653_v2  ;;  %v446_v40 = vstv %s2595_s30  ;;  %s2669_s30 = sld [smem:[#allocation4 + $0x2e]] }
 0x197   : > { %v1092_v42 = vstv %s2600_s6  ;;  %s2674_s6 = sld [smem:[#allocation4 + $0x39]] }
 0x198   : > { %v458_v0 = vstv %s2658_s27  ;;  %s2732_s27 = sld [smem:[#allocation4 + $0x3a]] }
 0x19a   : > { %v881_v44 = vstv %s2606_s17  ;;  %s2679_s17 = sld [smem:[#allocation4 + $0x44]]  ;;  %v1101_v3 = vstv %s2663_s28  ;;  %s2737_s28 = sld [smem:[#allocation4 + $0x45]] }
 0x19c   : > { %v890_v5 = vstv %s2669_s30  ;;  %s2742_s30 = sld [smem:[#allocation4 + $0x50]] }
 0x1f2   : > { %v736_v19 = vpop.permute.xlu1 %735 }
 0x1f3   : > { %v524_v16 = vpop.permute.xlu0 %523 }
 0x1f4   : > { %v530_v17 = vsel %vm525_vm3, %v524_v16, 0  ;;  %v1081_v16 = vsel %vm396_vm5, %v1080_v7, %v1078_v6  ;;  %vm448_vm5 = vcmp.eq.s32.totalorder %v2462_v28, 14  ;;  %v679_v7 = vstv %s2674_s6  ;;  %s2747_s6 = sld [smem:[#allocation4 + $0x33]] }
 0x1f5   : > { %1696 = vmatpush3.bf16.xpose.msra.mxu1 %v530_v17  ;;  %v1083_v17 = vstv %s2539_s29  ;;  %s2611_s29 = sld [smem:[#allocation4 + $0x2d]] }
 0x1f6   : > { %1707 = vmatprep.subr.bf16.mxu1 %v2131_v1  ;;  %v961_v22 = vpop.permute.xlu1 %960 }
 0x1f7   : > { %v741_v18 = vpop.permute.xlu0 %740  ;;  %v966_v23 = vsel %vm525_vm3, %v961_v22, 0  ;;  %v435_v22 = vsel %vm432_vm14, %v434_v15, %v431_v14 }
 0x1f8   : > { %v746_v21 = vsel %vm525_vm3, %v741_v18, 0  ;;  %v870_v18 = vsel %vm408_vm8, %v869_v9, %v867_v8  ;;  %v462_v9 = vstv %s2679_s17  ;;  %s2753_s17 = sld [smem:[#allocation4 + $0x3e]] }
 0x1fa   : > { %v1181_v24 = vpop.permute.xlu1 %1180 }
 0x1fb   : > { %v956_v25 = vpop.permute.xlu0 %955  ;;  %v1186_v26 = vsel %vm525_vm3, %v1181_v24, 0  ;;  %v1084_v24 = vsel %vm400_vm6, %v1083_v17, %v1081_v16  ;;  %v670_v46 = vstv %s2611_s29  ;;  %s2684_s29 = sld [smem:[#allocation4 + $0x27]]  ;;  %vm452_vm6 = vcmp.eq.s32.totalorder %v2462_v28, 15 }
 0x1fc   : > { %1698 = vmatmul.mubr.msk.bf16.vlgmr.msra.gmra.mrb[0].mxu1 %vm525_vm3, %v390_v20  ;;  %v659_v20 = vsel %vm420_vm11, %v658_v11, %v656_v10 }
 0x1fd   : > { %1708 = vmatpush3.bf16.xpose.msra.mxu1 %v746_v21  ;;  %1709 = vmatprep.mubr.msk.bf16.mxu1 %vm2132_vm0, %v2131_v1  ;;  %v661_v21 = vstv %s2550_s11  ;;  %s2621_s11 = sld [smem:[#allocation4 + $0x1b]] }
 0x1fe   : > { %1719 = vmatprep.subr.bf16.mxu1 %v2131_v1  ;;  %v662_v29 = vsel %vm424_vm12, %v661_v21, %v659_v20 }
 0x1ff   : > { %v1176_v27 = vpop.permute.xlu0 %1175  ;;  %v665_v37 = vsel %vm428_vm13, %v664_v30, %v662_v29  ;;  %v1110_v30 = vstv %s2726_s13  ;;  %s2800_s13 = sld [smem:[#allocation4 + $0x51]] }
 0x200   : > { %v668_v45 = vsel %vm432_vm14, %v667_v38, %v665_v37  ;;  %v1113_v38 = vstv %s2747_s6  ;;  %s2821_s6 = sld [smem:[#allocation4 + $0x55]] }
 0x201   : > { %v671_v53 = vsel %vm436_vm15, %v670_v46, %v668_v45  ;;  %v1104_v11 = vstv %s2684_s29  ;;  %s2758_s29 = sld [smem:[#allocation4 + $0x49]] }
 0x203   : > { %v1095_v50 = vstv %s2621_s11  ;;  %s2695_s11 = sld [smem:[#allocation4 + $0x3d]] }
 0x204   : > { %1710 = vmatmul.mubr.msk.bf16.vlgmr.msra.gmra.mrb[4].mxu1 %vm525_vm3, %v736_v19  ;;  %v872_v19 = vstv %s2544_s14  ;;  %s2616_s14 = sld [smem:[#allocation4 + $0x38]] }
 0x205   : > { %1720 = vmatpush3.bf16.xpose.msra.mxu1 %v966_v23  ;;  %1721 = vmatprep.mubr.msk.bf16.mxu1 %vm2132_vm0, %v2131_v1  ;;  %v438_v23 = vstv %s2553_s16  ;;  %s2627_s16 = sld [smem:[#allocation4 + $0x26]] }
 0x206   : > { %1731 = vmatprep.subr.bf16.mxu1 %v2131_v1  ;;  %v439_v31 = vsel %vm436_vm15, %v438_v23, %v435_v22 }
 0x207   : > { %v443_v39 = vsel %vm440_vm2, %v442_v32, %v439_v31  ;;  %v899_v32 = vstv %s2732_s27  ;;  %s2805_s27 = sld [smem:[#allocation4 + $0x5c]] }
 0x208   : > { %v447_v47 = vsel %vm444_vm4, %v446_v40, %v443_v39  ;;  %v902_v40 = vstv %s2753_s17  ;;  %s2826_s17 = sld [smem:[#allocation4 + $0x60]] }
 0x209   : > { %v682_v17 = vstv %s2695_s11  ;;  %s2768_s11 = sld [smem:[#allocation4 + $0x37]] }
 0x20a   : > { %v450_v48 = vstv %s2616_s14  ;;  %s2690_s14 = sld [smem:[#allocation4 + $0x32]] }
 0x20b   : > { %v884_v52 = vstv %s2627_s16  ;;  %v451_v55 = vsel %vm448_vm5, %v450_v48, %v447_v47  ;;  %s2700_s16 = sld [smem:[#allocation4 + $0x48]] }
 0x20c   : > { %1722 = vmatmul.mubr.msk.bf16.vlgmr.msra.gmra.mrb[8].mxu1 %vm525_vm3, %v956_v25  ;;  %v1086_v25 = vstv %s2558_s26  ;;  %s2632_s26 = sld [smem:[#allocation4 + $0x31]] }
 0x20d   : > { %1732 = vmatpush3.bf16.xpose.msra.mxu1 %v1186_v26  ;;  %1733 = vmatprep.mubr.msk.bf16.mxu1 %vm2132_vm0, %v2131_v1  ;;  %v873_v26 = vsel %vm412_vm9, %v872_v19, %v870_v18  ;;  %v1087_v33 = vsel %vm404_vm7, %v1086_v25, %v1084_v24  ;;  %vm456_vm7 = vcmp.eq.s32.totalorder %v2462_v28, 16  ;;  %v685_v25 = vstv %s2716_s25  ;;  %s2789_s25 = sld [smem:[#allocation4 + $0x3b]] }
 0x20e   : > { %1743 = vmatprep.subr.bf16.mxu1 %v2131_v1  ;;  %v1090_v41 = vsel %vm408_vm8, %v1089_v34, %v1087_v33  ;;  %vm460_vm8 = vcmp.eq.s32.totalorder %v2462_v28, 17  ;;  %v688_v34 = vstv %s2737_s28  ;;  %s2810_s28 = sld [smem:[#allocation4 + $0x3f]] }
 0x20f   : > { %v1093_v49 = vsel %vm412_vm9, %v1092_v42, %v1090_v41  ;;  %vm464_vm9 = vcmp.eq.s32.totalorder %v2462_v28, 18  ;;  %v691_v42 = vstv %s2758_s29  ;;  %v1116_v46 = vstv %s2768_s11  ;;  %s2831_s29 = sld [smem:[#allocation4 + $0x43]]  ;;  %s2842_s11 = sld [smem:[#allocation4 + $0x59]] }
 0x210   : > { %v1096_v57 = vsel %vm416_vm10, %v1095_v50, %v1093_v49  ;;  %v893_v15 = vstv %s2690_s14  ;;  %s2763_s14 = sld [smem:[#allocation4 + $0x54]] }
 0x211   : > { %v1099_v2 = vsel %vm420_vm11, %v1098_v58, %v1096_v57  ;;  %v466_v19 = vstv %s2700_s16  ;;  %s2774_s16 = sld [smem:[#allocation4 + $0x42]]  ;;  %v697_v58 = vstv %s2800_s13  ;;  %s2873_s13 = sld [smem:[#allocation4 + $0x4b]] }
 0x212   : > { %v673_v54 = vstv %s2632_s26  ;;  %s2705_s26 = sld [smem:[#allocation4 + $0x2b]]  ;;  %v1102_v10 = vsel %vm424_vm12, %v1101_v3, %v1099_v2  ;;  %v700_v3 = vstv %s2821_s6  ;;  %s2894_s6 = sld [smem:[#allocation4 + $0x4f]] }
 0x213   : > { %v674_v61 = vsel %vm440_vm2, %v673_v54, %v671_v53  ;;  %v1105_v20 = vsel %vm428_vm13, %v1104_v11, %v1102_v10  ;;  %v1119_v54 = vstv %s2789_s25  ;;  %s2863_s25 = sld [smem:[#allocation4 + $0x5d]] }
 0x214   : > { %1734 = vmatmul.mubr.msk.bf16.vlgmr.msra.gmra.mrb[12].mxu1 %vm525_vm3, %v1176_v27  ;;  %v875_v27 = vstv %s2564_s9  ;;  %s2637_s9 = sld [smem:[#allocation4 + $0x3c]]  ;;  %v677_v6 = vsel %vm444_vm4, %v676_v62, %v674_v61  ;;  %v1122_v62 = vstv %s2810_s28  ;;  %s2884_s28 = sld [smem:[#allocation4 + $0x61]] }
 0x215   : > { %1747 = vmatprep.mubr.msk.bf16.mxu1 %vm2132_vm0, %v2131_v1  ;;  %v876_v35 = vsel %vm416_vm10, %v875_v27, %v873_v26  ;;  %v680_v16 = vsel %vm448_vm5, %v679_v7, %v677_v6  ;;  %vm468_vm10 = vcmp.eq.s32.totalorder %v2462_v28, 19  ;;  %v470_v27 = vstv %s2721_s12  ;;  %s2795_s12 = sld [smem:[#allocation4 + $0x46]] }
 0x216   : > { %v879_v43 = vsel %vm420_vm11, %v878_v36, %v876_v35  ;;  %v683_v24 = vsel %vm452_vm6, %v682_v17, %v680_v16  ;;  %vm472_vm11 = vcmp.eq.s32.totalorder %v2462_v28, 20  ;;  %v474_v36 = vstv %s2742_s30  ;;  %s2816_s30 = sld [smem:[#allocation4 + $0x4a]] }
 0x217   : > { %v882_v51 = vsel %vm424_vm12, %v881_v44, %v879_v43  ;;  %v686_v33 = vsel %vm456_vm7, %v685_v25, %v683_v24  ;;  %vm476_vm12 = vcmp.eq.s32.totalorder %v2462_v28, 21  ;;  %v478_v44 = vstv %s2763_s14  ;;  %s2837_s14 = sld [smem:[#allocation4 + $0x4e]] }
 0x218   : > { %v885_v59 = vsel %vm428_vm13, %v884_v52, %v882_v51  ;;  %v1107_v21 = vstv %s2705_s26  ;;  %s2779_s26 = sld [smem:[#allocation4 + $0x4d]]  ;;  %v689_v41 = vsel %vm460_vm8, %v688_v34, %v686_v33  ;;  %v905_v48 = vstv %s2774_s16  ;;  %s2847_s16 = sld [smem:[#allocation4 + $0x64]] }
 0x219   : > { %v888_v4 = vsel %vm432_vm14, %v887_v60, %v885_v59  ;;  %v1108_v29 = vsel %vm432_vm14, %v1107_v21, %v1105_v20  ;;  %vm480_vm13 = vcmp.eq.s32.totalorder %v2462_v28, 22  ;;  %v692_v49 = vsel %vm464_vm9, %v691_v42, %v689_v41 }
 0x21a   : > { %v454_v56 = vstv %s2637_s9  ;;  %s2711_s9 = sld [smem:[#allocation4 + $0x36]]  ;;  %v891_v14 = vsel %vm436_vm15, %v890_v5, %v888_v4  ;;  %v1111_v37 = vsel %vm436_vm15, %v1110_v30, %v1108_v29  ;;  %vm484_vm14 = vcmp.eq.s32.totalorder %v2462_v28, 23 }
 0x21b   : > { %v455_v63 = vsel %vm452_vm6, %v454_v56, %v451_v55  ;;  %v894_v22 = vsel %vm440_vm2, %v893_v15, %v891_v14  ;;  %v1114_v45 = vsel %vm440_vm2, %v1113_v38, %v1111_v37  ;;  %v908_v56 = vstv %s2795_s12  ;;  %s2868_s12 = sld [smem:[#allocation4 + $0x68]] }
 0x21c   : > { %v459_v8 = vsel %vm456_vm7, %v458_v0, %v455_v63  ;;  %v1117_v53 = vsel %vm444_vm4, %v1116_v46, %v1114_v45  ;;  %v486_v60 = vstv %s2805_s27  ;;  %v911_v0 = vstv %s2816_s30  ;;  %s2879_s27 = sld [smem:[#allocation4 + $0x56]]  ;;  %s2889_s30 = sld [smem:[#allocation4 + $0x6c]] }
 0x21d   : > { %v463_v18 = vsel %vm460_vm8, %v462_v9, %v459_v8  ;;  %v1120_v61 = vsel %vm448_vm5, %v1119_v54, %v1117_v53  ;;  %vm488_vm15 = vcmp.eq.s32.totalorder %v2462_v28, 24  ;;  %v490_v5 = vstv %s2826_s17  ;;  %s2900_s17 = sld [smem:[#allocation4 + $0x5a]] }
 0x21e   : > { %v467_v26 = vsel %vm464_vm9, %v466_v19, %v463_v18  ;;  %v694_v50 = vstv %s2779_s26  ;;  %s2852_s26 = sld [smem:[#allocation4 + $0x47]]  ;;  %v1123_v6 = vsel %vm452_vm6, %v1122_v62, %v1120_v61  ;;  %v1125_v7 = vstv %s2831_s29  ;;  %s2905_s29 = sld [smem:[#allocation4 + $0x65]] }
 0x21f   : > { %v471_v35 = vsel %vm468_vm10, %v470_v27, %v467_v26  ;;  %v695_v57 = vsel %vm468_vm10, %v694_v50, %v692_v49  ;;  %v914_v9 = vstv %s2837_s14  ;;  %vm492_vm2 = vcmp.eq.s32.totalorder %v2462_v28, 25  ;;  %s2910_s14 = sld [smem:[#allocation4 + $0x70]] }
 0x220   : > { %v896_v23 = vstv %s2711_s9  ;;  %s2784_s9 = sld [smem:[#allocation4 + $0x58]]  ;;  %v475_v43 = vsel %vm472_vm11, %v474_v36, %v471_v35  ;;  %v698_v2 = vsel %vm472_vm11, %v697_v58, %v695_v57  ;;  %v703_v11 = vstv %s2842_s11  ;;  %s2915_s11 = sld [smem:[#allocation4 + $0x53]] }
 0x221   : > { %v897_v31 = vsel %vm444_vm4, %v896_v23, %v894_v22  ;;  %v479_v51 = vsel %vm476_vm12, %v478_v44, %v475_v43  ;;  %v701_v10 = vsel %vm476_vm12, %v700_v3, %v698_v2  ;;  %v494_v15 = vstv %s2847_s16  ;;  %s2921_s16 = sld [smem:[#allocation4 + $0x5e]] }
 0x222   : > { %v900_v39 = vsel %vm448_vm5, %v899_v32, %v897_v31  ;;  %v1126_v16 = vsel %vm456_vm7, %v1125_v7, %v1123_v6  ;;  %vm496_vm4 = vcmp.eq.s32.totalorder %v2462_v28, 26  ;;  %v704_v20 = vsel %vm480_vm13, %v703_v11, %v701_v10 }
 0x223   : > { %v903_v47 = vsel %vm452_vm6, %v902_v40, %v900_v39  ;;  %v706_v21 = vstv %s2863_s25  ;;  %v498_v23 = vstv %s2868_s12  ;;  %v1131_v25 = vstv %s2873_s13  ;;  %s2936_s25 = sld [smem:[#allocation4 + $0x57]]  ;;  %s2942_s12 = sld [smem:[#allocation4 + $0x62]] }
 0x224   : > { %v906_v55 = vsel %vm456_vm7, %v905_v48, %v903_v47  ;;  %v1128_v17 = vstv %s2852_s26  ;;  %s2926_s26 = sld [smem:[#allocation4 + $0x69]]  ;;  %v920_v27 = vstv %s2879_s27  ;;  %vm500_vm5 = vcmp.eq.s32.totalorder %v2462_v28, 27  ;;  %s2947_s13 = sld [smem:[#allocation4 + $0x6d]] }
 0x225   : > { %v909_v63 = vsel %vm460_vm8, %v908_v56, %v906_v55  ;;  %v1129_v24 = vsel %vm460_vm8, %v1128_v17, %v1126_v16  ;;  %v707_v29 = vsel %vm484_vm14, %v706_v21, %v704_v20  ;;  %v709_v30 = vstv %s2884_s28  ;;  %s2952_s27 = sld [smem:[#allocation4 + $0x78]]  ;;  %s2957_s28 = sld [smem:[#allocation4 + $0x5b]] }
 0x226   : > { %v482_v52 = vstv %s2784_s9  ;;  %s2858_s9 = sld [smem:[#allocation4 + $0x52]]  ;;  %v912_v8 = vsel %vm464_vm9, %v911_v0, %v909_v63  ;;  %v502_v32 = vstv %s2889_s30  ;;  %v1132_v33 = vsel %vm464_vm9, %v1131_v25, %v1129_v24  ;;  %s2963_s30 = sld [smem:[#allocation4 + $0x66]] }
 0x227   : > { %v483_v59 = vsel %vm480_vm13, %v482_v52, %v479_v51  ;;  %v915_v18 = vsel %vm468_vm10, %v914_v9, %v912_v8  ;;  %v1134_v34 = vstv %s2894_s6  ;;  %v923_v36 = vstv %s2900_s17  ;;  %s2968_s6 = sld [smem:[#allocation4 + $0x71]]  ;;  %s2973_s17 = sld [smem:[#allocation4 + $0x7c]] }
 0x228   : > { %v487_v4 = vsel %vm484_vm14, %v486_v60, %v483_v59  ;;  %vm504_vm6 = vcmp.eq.s32.totalorder %v2462_v28, 28  ;;  %v710_v37 = vsel %vm488_vm15, %v709_v30, %v707_v29  ;;  %v712_v38 = vstv %s2905_s29  ;;  %s2978_s29 = sld [smem:[#allocation4 + $0x5f]] }
 0x229   : > { %v491_v14 = vsel %vm488_vm15, %v490_v5, %v487_v4  ;;  %v506_v40 = vstv %s2910_s14  ;;  %v1135_v41 = vsel %vm468_vm10, %v1134_v34, %v1132_v33  ;;  %v1137_v42 = vstv %s2915_s11  ;;  %s2984_s14 = sld [smem:[#allocation4 + $0x6a]]  ;;  %s2989_s11 = sld [smem:[#allocation4 + $0x75]] }
 0x22a   : > { %v495_v22 = vsel %vm492_vm2, %v494_v15, %v491_v14  ;;  %v926_v44 = vstv %s2921_s16  ;;  %vm508_vm7 = vcmp.eq.s32.totalorder %v2462_v28, 29  ;;  %v713_v45 = vsel %vm492_vm2, %v712_v38, %v710_v37  ;;  %s2997_s16 = sld [smem:[#allocation4 + $0x63]] }
 0x22b   : > { %v499_v31 = vsel %vm496_vm4, %v498_v23, %v495_v22  ;;  %v715_v46 = vstv %s2926_s26  ;;  %v1138_v49 = vsel %vm472_vm11, %v1137_v42, %v1135_v41  ;;  %v1140_v50 = vstv %s2936_s25  ;;  %s3003_s26 = sld [smem:[#allocation4 + $0x6e]]  ;;  %s3016_s25 = sld [smem:[#allocation4 + $0x67]] }
 0x22c   : > { %v917_v19 = vstv %s2858_s9  ;;  %s2931_s9 = sld [smem:[#allocation4 + $0x74]]  ;;  %v503_v39 = vsel %vm500_vm5, %v502_v32, %v499_v31  ;;  %v929_v52 = vstv %s2942_s12  ;;  %vm512_vm8 = vcmp.eq.s32.totalorder %v2462_v28, 30  ;;  %s3022_s12 = sld [smem:[#allocation4 + $0x72]] }
 0x22d   : > { %v918_v26 = vsel %vm472_vm11, %v917_v19, %v915_v18  ;;  %v507_v47 = vsel %vm504_vm6, %v506_v40, %v503_v39  ;;  %v716_v53 = vsel %vm496_vm4, %v715_v46, %v713_v45  ;;  %v718_v54 = vstv %s2947_s13  ;;  %s3027_s13 = sld [smem:[#allocation4 + $0x7d]] }
 0x22e   : > { %v921_v35 = vsel %vm476_vm12, %v920_v27, %v918_v26  ;;  %v514_v56 = vstv %s2952_s27  ;;  %v1141_v57 = vsel %vm476_vm12, %v1140_v50, %v1138_v49  ;;  %v1143_v58 = vstv %s2957_s28  ;;  %s3035_s27 = sld [smem:[#allocation4 + $0x6b]]  ;;  %s3040_s28 = sld [smem:[#allocation4 + $0x76]] }
 0x22f   : > { %v924_v43 = vsel %vm480_vm13, %v923_v36, %v921_v35  ;;  %v932_v60 = vstv %s2963_s30  ;;  %vm516_vm9 = vcmp.eq.s32.totalorder %v2462_v28, 31  ;;  %v719_v61 = vsel %vm500_vm5, %v718_v54, %v716_v53  ;;  %s3050_s30 = sld [smem:[#allocation4 + $0x6f]] }
 0x230   : > { %v927_v51 = vsel %vm484_vm14, %v926_v44, %v924_v43  ;;  %v721_v62 = vstv %s2968_s6  ;;  %v518_v0 = vstv %s2973_s17  ;;  %v1144_v2 = vsel %vm480_vm13, %v1143_v58, %v1141_v57  ;;  %s3055_s6 = sld [smem:[#allocation4 + $0x7a]]  ;;  %s1650_s17 = sld [smem:[#allocation4 + $0x73]] }
 0x231   : > { %v930_v59 = vsel %vm488_vm15, %v929_v52, %v927_v51  ;;  %v1146_v3 = vstv %s2978_s29  ;;  %v935_v5 = vstv %s2984_s14  ;;  %v722_v6 = vsel %vm504_vm6, %v721_v62, %v719_v61  ;;  %s1617_s29 = sld [smem:[#allocation4 + $0x7e]]  ;;  %s1651_s14 = sld [smem:[#allocation4 + $0x77]] }
 0x232   : > { %v510_v48 = vstv %s2931_s9  ;;  %s3008_s9 = sld [smem:[#allocation4 + $0x79]]  ;;  %v933_v4 = vsel %vm492_vm2, %v932_v60, %v930_v59  ;;  %v724_v7 = vstv %s2989_s11  ;;  %v1147_v9 = vsel %vm484_vm14, %v1146_v3, %v1144_v2  ;;  %s1652_s11 = sld [smem:[#allocation4 + $0x7b]] }
 0x233   : > { %v511_v55 = vsel %vm508_vm7, %v510_v48, %v507_v47  ;;  %v1149_v10 = vstv %s2997_s16  ;;  %v936_v11 = vsel %vm496_vm4, %v935_v5, %v933_v4  ;;  %v938_v14 = vstv %s3003_s26  ;;  %s1653_s16 = sld [smem:[#allocation4 + $0x7f]]  ;;  %s2140_s26 = smov 56  }
 0x234   : > { %v515_v63 = vsel %vm512_vm8, %v514_v56, %v511_v55  ;;  %v725_v16 = vsel %vm508_vm7, %v724_v7, %v722_v6  ;;  %v1150_v20 = vsel %vm488_vm15, %v1149_v10, %v1147_v9  ;;  %v1152_v21 = vstv %s3016_s25  ;;  %s2142_s25 = smov 40  }
 0x235   : > { %v519_v8 = vsel %vm516_vm9, %v518_v0, %v515_v63  ;;  %v939_v23 = vsel %vm500_vm5, %v938_v14, %v936_v11  ;;  %v941_v24 = vstv %s3022_s12  ;;  %v730_v29 = vstv %s3027_s13  ;;  %s2143_s12 = smov 48   ;;  %s2144_s13 = smov 8  }
 0x236   : > { %v1153_v30 = vsel %vm492_vm2, %v1152_v21, %v1150_v20  ;;  %v1155_v31 = vstv %s3035_s27  ;;  %v942_v32 = vsel %vm504_vm6, %v941_v24, %v939_v23  ;;  %v944_v33 = vstv %s3040_s28  ;;  %v1899_v23 = vld [vmem:[#allocation2] ss:$0 sps:$4 sm:$0xff]   ;;  %s2145_s27 = smov 16   ;;  %s2146_s28 = smov 24  }
 0x237   : > { %v1156_v35 = vsel %vm496_vm4, %v1155_v31, %v1153_v30  ;;  %v1158_v36 = vstv %s3050_s30  ;;  %v945_v38 = vsel %vm508_vm7, %v944_v33, %v942_v32  ;;  %v947_v39 = vstv %s3055_s6  ;;  %s1512_s30 = sshll.u32 %s2409_s24, 3  ;;  %s1662_s6 = sshll.u32 %s2114_s21, 7 }
 0x238   : > { %v727_v17 = vstv %s3008_s9  ;;  %v1159_v43 = vsel %vm500_vm5, %v1158_v36, %v1156_v35  ;;  %v1161_v44 = vstv %s1650_s17  ;;  %v948_v47 = vsel %vm512_vm8, %v947_v39, %v945_v38  ;;  %s2141_s9 = smov 64   ;;  %s314_s17 = scalar_lea.vmem [#allocation14], %s1512_s30 }
 0x239   : > { %v728_v27 = vsel %vm512_vm8, %v727_v17, %v725_v16  ;;  %v950_v48 = vstv %s1617_s29  ;;  %v1162_v49 = vsel %vm504_vm6, %v1161_v44, %v1159_v43  ;;  %v1164_v50 = vstv %s1651_s14  ;;  %s1372_s29 = sshll.u32 %s314_s17, 4  ;;  %s2147_s21 = smov [#allocation14]   ;;  %s3131_s29 = int_to_ptr.vmem [resolvable:$true] %s1372_s29 }
 0x23a   : > { %v731_v34 = vsel %vm516_vm9, %v730_v29, %v728_v27  ;;  %v951_v51 = vsel %vm516_vm9, %v950_v48, %v948_v47  ;;  %v1165_v53 = vsel %vm508_vm7, %v1164_v50, %v1162_v49  ;;  %v1167_v54 = vstv %s1652_s11  ;;  %v1900_v29 = vld [vmem:[#allocation2] ss:$0 sps:$4 sm:$0xff]  }
 0x23b   : > { %v1168_v60 = vsel %vm512_vm8, %v1167_v54, %v1165_v53  ;;  %v1170_v61 = vstv %s1653_s16  ;;  %vm589_vm10 = vcmask 1043456   ;;  %vm1292_vm11 = vcmask 261312   ;;  %s3129_s16 = scalar_lea.hbm %s3184_s5, %s1662_s6 }
 0x23c   : > { %v1171_v62 = vsel %vm516_vm9, %v1170_v61, %v1168_v60  ;;  %v1881_v60 = vld [vmem:[#allocation11] sm:$0xff]   ;;  %v1882_v61 = vld [vmem:[#allocation11 + $0x8] sm:$0xff]  }
 0x23d   : > { %1744 = vmatpush3.bf16.msra.mxu1 %v1881_v60 }
 0x23e   : > { %1745 = vmatprep.subr.bf16.mxu1 %v2131_v1 }
 0x241   : > { %1746 = vmatpush3.bf16.msra.mxu1 %v1882_v61 }
 0x2cf   : > { %v566_v15 = vpop.f32.mrb[0].mxu1 }
 0x2d0   : > { %v567_v18 = vadd.f32 %v566_v15, %v519_v8  ;;  %v1699_v19 = vpop.f32.mrb[1].mxu1 }
 0x2d1   : > { %v569_v22 = vpop.f32.mrb[2].mxu1 }
 0x2d2   : > { %v1700_v25 = vpop.f32.mrb[3].mxu1  ;;  %v572_v26 = vsel %vm525_vm3, %v567_v18, -inf }
 0x2d3   : > { %573 = vmax.xlane.f32.xlu1 %v572_v26 }
 0x2d7   : > { %v782_v37 = vpop.f32.mrb[4].mxu1 }
 0x2d8   : > { %v783_v40 = vadd.f32 %v782_v37, %v731_v34  ;;  %v1711_v41 = vpop.f32.mrb[5].mxu1 }
 0x2d9   : > { %v785_v42 = vpop.f32.mrb[6].mxu1 }
 0x2da   : > { %v1712_v45 = vpop.f32.mrb[7].mxu1  ;;  %v788_v46 = vsel %vm525_vm3, %v783_v40, -inf }
 0x2db   : > { %789 = vmax.xlane.f32.xlu0 %v788_v46 }
 0x2df   : > { %v1002_v52 = vpop.f32.mrb[8].mxu1 }
 0x2e0   : > { %v1003_v55 = vadd.f32 %v1002_v52, %v951_v51  ;;  %v1723_v56 = vpop.f32.mrb[9].mxu1 }
 0x2e1   : > { %v1005_v57 = vpop.f32.mrb[10].mxu1 }
 0x2e2   : > { %v1724_v58 = vpop.f32.mrb[11].mxu1  ;;  %v1008_v59 = vsel %vm525_vm3, %v1003_v55, -inf }
 0x2e3   : > { %1009 = vmax.xlane.f32.xlu0 %v1008_v59 }
 0x2e7   : > { %v1222_v63 = vpop.f32.mrb[12].mxu1 }
 0x2e8   : > { %v1223_v0 = vadd.f32 %v1222_v63, %v1171_v62  ;;  %v1735_v2 = vpop.f32.mrb[13].mxu1 }
 0x2e9   : > { %v1225_v3 = vpop.f32.mrb[14].mxu1 }
 0x2ea   : > { %v1736_v4 = vpop.f32.mrb[15].mxu1  ;;  %v1228_v5 = vsel %vm525_vm3, %v1223_v0, -inf }
 0x2eb   : > { %1229 = vmax.xlane.f32.xlu1 %v1228_v5 }
 0x360   : > { %v574_v6 = vpop.xlane.xlu1 %573 }
 0x361   : > { %v575_v7 = vsub.f32 %v567_v18, %v574_v6 }
 0x363   : > { %v576_v8 = vmul.f32 1.442695, %v575_v7 }
 0x365   : > { %1883 = vpow2.f32 %v576_v8 }
 0x368   : > { %v790_v9 = vpop.xlane.xlu0 %789 }
 0x369   : > { %v791_v10 = vsub.f32 %v783_v40, %v790_v9 }
 0x36b   : > { %v792_v11 = vmul.f32 1.442695, %v791_v10 }
 0x36d   : > { %1885 = vpow2.f32 %v792_v11 }
 0x36f   : > { %v1884_v14 = vpop.eup %1883 }
 0x370   : > { %v1010_v15 = vpop.xlane.xlu0 %1009  ;;  %v578_v28 = vsel %vm525_vm3, %v1884_v14, 0.0 }
 0x371   : > { %v1011_v16 = vsub.f32 %v1003_v55, %v1010_v15  ;;  %579 = vadd.xlane.f32.xlu0 %v578_v28 }
 0x373   : > { %v1012_v17 = vmul.f32 1.442695, %v1011_v16 }
 0x375   : > { %1887 = vpow2.f32 %v1012_v17 }
 0x377   : > { %v1886_v19 = vpop.eup %1885 }
 0x378   : > { %v794_v20 = vsel %vm525_vm3, %v1886_v19, 0.0  ;;  %v1230_v22 = vpop.xlane.xlu1 %1229 }
 0x379   : > { %795 = vadd.xlane.f32.xlu1 %v794_v20  ;;  %v1231_v24 = vsub.f32 %v1223_v0, %v1230_v22 }
 0x37b   : > { %v1232_v25 = vmul.f32 1.442695, %v1231_v24 }
 0x37d   : > { %1889 = vpow2.f32 %v1232_v25 }
 0x37f   : > { %v1888_v21 = vpop.eup %1887 }
 0x380   : > { %v1014_v18 = vsel %vm525_vm3, %v1888_v21, 0.0 }
 0x381   : > { %1015 = vadd.xlane.f32.xlu0 %v1014_v18 }
 0x387   : > { %v1890_v26 = vpop.eup %1889 }
 0x388   : > { %v1234_v27 = vsel %vm525_vm3, %v1890_v26, 0.0 }
 0x38a   : > { %800 = vrot.lane.b32.xlu1 %v2436_v12, %s2140_s26  ;;  %s1358_s26 = scalar_lea.sflag [#allocation6], %s2409_s24 }
 0x397   : > { %584 = vrot.lane.b32.xlu0 %v1899_v23, %s2141_s9  ;;  %s2028_s9 = scalar_lea.vmem %s3131_s29, 128 }
 0x398   : > { %p2029_p10 = scmp.ne.s32.totalorder %s3131_s29, %s2028_s9 }
 0x39a   : > { %p2030_p13 = pnand %p2029_p10, %p3201_p11 }
 0x39b   : > { %1240 = vrot.lane.b32.xlu0 %v2439_v13, %s2142_s25  ;;  %s2032_s25 = sshll.u32 %s2147_s21, 4  ;;  %s2033_s25 = int_to_ptr.vmem [resolvable:$false] %s2032_s25 }
 0x39c   : > { %p2031_p2 = pneg %p2030_p13  ;;  %p2035_p4 = scmp.lt.s32.totalorder %s3131_s29, %s2033_s25 }
 0x3ae   : > { %1235 = vadd.xlane.f32.xlu1 %v1234_v27 }
 0x3bf   : > { %1020 = vrot.lane.b32.xlu1 %v1900_v29, %s2143_s12  ;;  %s2034_s12 = scalar_lea.vmem %s2033_s25, 256 }
 0x3c0   : > { %p2036_p12 = scmp.lt.s32.totalorder %s2034_s12, %s2028_s9 }
 0x3c2   : > { %p2037_p0 = por %p2036_p12, %p2035_p4 }
 0x3c4   : > { %p2038_p1 = pnand %p2037_p0, %p2031_p2 }
 0x3fe   : > { %v580_v30 = vpop.xlane.xlu0 %579 }
 0x3ff   : > { %1891 = vrcp.f32 %v580_v30 }
 0x406   : > { %v796_v12 = vpop.xlane.xlu1 %795 }
 0x407   : > { %1893 = vrcp.f32 %v796_v12 }
 0x409   : > { %v1892_v31 = vpop.eup %1891 }
 0x40a   : > { %v582_v33 = vmul.f32 %v1892_v31, %v1884_v14  ;;  %v801_v35 = vpop.permute.xlu1 %800 }
 0x40b   : > { %v806_v38 = vsel %vm589_vm10, %v801_v35, 0 }
 0x40c   : > { %v583_v36 = vpack.c.bf16 %v582_v33, %v582_v33 }
 0x40e   : > { %v1016_v32 = vpop.xlane.xlu0 %1015 }
 0x40f   : > { %1895 = vrcp.f32 %v1016_v32 }
 0x411   : > { %v1894_v37 = vpop.eup %1893 }
 0x412   : > { %v585_v34 = vpop.permute.xlu0 %584  ;;  %v798_v39 = vmul.f32 %v1894_v37, %v1886_v19 }
 0x413   : > { %v591_v13 = vsel %vm589_vm10, %v585_v34, 0 }
 0x414   : > { %1702 = vmatpush3.bf16.msra.mxu0 %v591_v13  ;;  %v799_v40 = vpack.c.bf16 %v798_v39, %v798_v39 }
 0x415   : > { %1713 = vmatprep.subr.bf16.mxu0 %v2131_v1 }
 0x416   : > { %v1241_v46 = vpop.permute.xlu0 %1240 }
 0x417   : > { %1704 = vmatmul.mubr.msk.bf16.vlgmr.msra.gmra.mrb[4].mxu0 %vm525_vm3, %v583_v36  ;;  %v1246_v48 = vsel %vm589_vm10, %v1241_v46, 0 }
 0x418   : > { %1714 = vmatpush3.bf16.msra.mxu0 %v806_v38  ;;  %1715 = vmatprep.mubr.msk.bf16.mxu0 %vm2132_vm0, %v2131_v1 }
 0x419   : > { %1725 = vmatprep.subr.bf16.mxu0 %v2131_v1  ;;  %v1896_v41 = vpop.eup %1895 }
 0x41a   : > { %v1018_v43 = vmul.f32 %v1896_v41, %v1888_v21 }
 0x41c   : > { %v1019_v47 = vpack.c.bf16 %v1018_v43, %v1018_v43 }
 0x41f   : > { %1716 = vmatmul.mubr.msk.bf16.vlgmr.msra.gmra.mrb[8].mxu0 %vm525_vm3, %v799_v40 }
 0x420   : > { %1727 = vmatprep.mubr.msk.bf16.mxu0 %vm2132_vm0, %v2131_v1 }
 0x43b   : > { %v1236_v42 = vpop.xlane.xlu1 %1235 }
 0x43c   : > { %1897 = vrcp.f32 %v1236_v42 }
 0x43f   : > { %v1021_v44 = vpop.permute.xlu1 %1020 }
 0x440   : > { %v1026_v45 = vsel %vm589_vm10, %v1021_v44, 0 }
 0x441   : > { %1726 = vmatpush3.bf16.msra.mxu0 %v1026_v45 }
 0x442   : > { %1737 = vmatprep.subr.bf16.mxu0 %v2131_v1 }
 0x444   : > { %1728 = vmatmul.mubr.msk.bf16.vlgmr.msra.gmra.mrb[12].mxu0 %vm525_vm3, %v1019_v47 }
 0x445   : > { %1738 = vmatpush3.bf16.msra.mxu0 %v1246_v48  ;;  %1739 = vmatprep.mubr.msk.bf16.mxu0 %vm2132_vm0, %v2131_v1  ;;  %vm852_vm0 = vcmask 130112  }
 0x446   : > { %v1898_v49 = vpop.eup %1897 }
 0x447   : > { %v1238_v50 = vmul.f32 %v1898_v49, %v1890_v26 }
 0x449   : > { %v1239_v51 = vpack.c.bf16 %v1238_v50, %v1238_v50 }
 0x44c   : > { %1740 = vmatmul.mubr.msk.bf16.vlgmr.msra.gmra.mrb[16].mxu0 %vm525_vm3, %v1239_v51 }
 0x4ea   : > { %v627_v52 = vpop.f32.mrb[4].mxu0 }
 0x4eb   : > { %633 = vst.msk [vmem:[#allocation3] sm:$0xff] %vm525_vm3, %v627_v52  ;;  %v1705_v53 = vpop.f32.mrb[5].mxu0  ;;  %vm1072_vm3 = vcmask 195712  }
 0x4ec   : > { %v630_v54 = vpop.f32.mrb[6].mxu0 }
 0x4ed   : > { %v1706_v55 = vpop.f32.mrb[7].mxu0 }
 0x4f2   : > { %v842_v56 = vpop.f32.mrb[8].mxu0 }
 0x4f3   : > { %849 = vrot.lane.b32.xlu1 %v842_v56, %s2144_s13  ;;  %v1717_v57 = vpop.f32.mrb[9].mxu0 }
 0x4f4   : > { %v845_v58 = vpop.f32.mrb[10].mxu0 }
 0x4f5   : > { %v1718_v59 = vpop.f32.mrb[11].mxu0 }
 0x517   : > { %v1062_v62 = vpop.f32.mrb[12].mxu0 }
 0x518   : > { %1069 = vrot.lane.b32.xlu0 %v1062_v62, %s2145_s27  ;;  %v1729_v63 = vpop.f32.mrb[13].mxu0 }
 0x519   : > { %v1065_v0 = vpop.f32.mrb[14].mxu0 }
 0x51a   : > { %v1730_v2 = vpop.f32.mrb[15].mxu0 }
 0x51f   : > { %v1282_v3 = vpop.f32.mrb[16].mxu0 }
 0x520   : > { %1289 = vrot.lane.b32.xlu1 %v1282_v3, %s2146_s28  ;;  %v1741_v4 = vpop.f32.mrb[17].mxu0 }
 0x521   : > { %v1285_v5 = vpop.f32.mrb[18].mxu0 }
 0x522   : > { %v1742_v6 = vpop.f32.mrb[19].mxu0 }
 0x565   : > { %v850_v7 = vpop.permute.xlu1 %849 }
 0x566   : > { %853 = vst.msk [vmem:[#allocation3] sm:$0xff] %vm852_vm0, %v850_v7 }
 0x58a   : > { %v1070_v1 = vpop.permute.xlu0 %1069 }
 0x58b   : > { %1073 = vst.msk [vmem:[#allocation3] sm:$0xff] %vm1072_vm3, %v1070_v1 }
 0x592   : > { %v1290_v8 = vpop.permute.xlu1 %1289 }
 0x593   : > { %1293 = vst.msk [vmem:[#allocation3] sm:$0xff] %vm1292_vm11, %v1290_v8 }
 0x59a   : > { %v1294_v9 = vld [vmem:[#allocation3] sm:$0xff] }
 0x59b   : > { %v1295_v10 = vpack.c.bf16 %v1294_v9, %v1294_v9 }
 0x59d   : > { %1748 = vmatmul.mubr.msk.bf16.vlgmr.msra.gmra.mrb[16].mxu1 %vm337_vm1, %v1295_v10 }
 0x670   : > { %v1350_v11 = vpop.f32.mrb[16].mxu1 }
 0x671   : > { %1356 = vst.msk [vmem:[%s314_s17] sm:$0xff] %vm337_vm1, %v1350_v11  ;;  %v1749_v14 = vpop.f32.mrb[17].mxu1 }
 0x672   : > { %v1353_v15 = vpop.f32.mrb[18].mxu1 }
 0x673   : > { %2041 = shalt.err (!%p2038_p1)
}
 0x674   : > { %s2042_s24 = scalar_lea.hbm %s3129_s16, 128  ;;  %s2046_s28 = scalar_lea.hbm %s3184_s5, 256 }
 0x675   : > { %p2043_p8 = scmp.ne.s32.totalorder %s3129_s16, %s2042_s24  ;;  %p2047_p9 = scmp.lt.u32.totalorder %s3129_s16, %s3184_s5 }
 0x676   : > { %p2048_p7 = scmp.lt.u32.totalorder %s2046_s28, %s2042_s24  ;;  %p2050_p10 = scmp.lt.u32.totalorder %s2042_s24, %s3129_s16 }
 0x677   : > { %p2044_p5 = pnand %p2043_p8, %p3201_p11 }
 0x678   : > { %p2049_p3 = por %p2048_p7, %p2047_p9 }
 0x679   : > { %p2045_p6 = pneg %p2044_p5 }
 0x67a   : > { %p2051_p13 = por %p2050_p10, %p2049_p3 }
 0x67c   : > { %p2052_p2 = pnand %p2051_p13, %p2045_p6 }
 0x67e   : > { %2055 = shalt.err (!%p2052_p2)
}
 0x67f   : > { %1769 = dma.vmem_to_hbm [thread:$0]  (%p3201_p11), %s3131_s29, 128, %s3129_s16, %s1358_s26   ;;  %v1750_v28 = vpop.f32.mrb[19].mxu1 }
 0x680 PF: > { %s1384_s17 = sand.u32 1, %s2102_s18   ;;  %p3202_p4 = scmp.ne.s32.totalorder %s3197_s10, 0 }
 0x681   : > { %p3203_p12 = scmp.ge.s32.totalorder %s2122_s23, 2  ;;  %s1385_s14 = scalar_lea.sflag [#allocation6], %s1384_s17 }
 0x683   : > { %p1789_p0 = pnand %p3203_p12, %p3202_p4 }
 0x685   : > { %2097 = dma.done.wait (!%p1789_p0), %s1385_s14, 128  }
 0x686   : > { %2099 = vsyncadd (!%p1789_p0), %s1385_s14, 4294967168  ;;  %s24_s23 = sadd.s32 1, %s2122_s23   ;;  %s3204_s18 = smov %s2106_s19 }
 0x687   : > { %p21_p1 = scmp.ge.s32.totalorder %s24_s23, 4   ;;  %s3205_s19 = smov %s2110_s20 }
 0x688   : > { %s3206_s20 = smov %s2355_s8  ;;  %s3207_s21 = smov %s2118_s22 }
 0x689   : > { %s3208_s22 = smov %s3210_s15  ;;  %23 = sbr.rel (!%p21_p1) target bundleno = 9 (0x9), region = 108 }
 0x690   :  { %1390 = vsyncpa [#allocation5], 1 }
 0x691   :  { %1392 = vsyncpa [#allocation5 + $0x1], 1 }
 0x692   :  { %1393 = vsyncpa [#allocation10], 1 }
 0x693   :  { %1394 = vsyncpa [#allocation13], 1 }
 0x694   :  { %1395 = vsyncpa [#allocation6], 1 }
 0x695   :  { %1397 = vsyncpa [#allocation6 + $0x1], 1 }
 0x696   :  { %1398 = vsyncpa [#allocation7], 1 }
 0x697   :  { %1400 = vsyncpa [#allocation7 + $0x1], 1 }

</bundles_post_ra>
